<compile_context>
chip_gen: v7x
topology: tpu7x:2x2x1
jax: 0.10.0
libtpu: 0.0.40
codegen_flags: <defaults>
</compile_context>

<pallas_src>
import math

import jax
import jax.numpy as jnp
from jax import lax
from jax.experimental import pallas as pl
from jax.experimental.pallas import tpu as pltpu  # noqa: F401  (not required for the no-grid call)

# ---------------- model configuration (small, synthetic) ----------------
CONFIG = dict(
    pad_value=0,
    hidden_size=16,
    attn_heads=2,
    num_layers=2,
    num_input=1,
    feed_forward_hidden=128,       # 4 * hidden
    hidden_dropout_prob=0.0,
    attn_dropout_prob=0.0,
    hidden_act="gelu",
    output_self_attention=True,
    use_position_embedding=False,
)
HIDDEN = CONFIG["hidden_size"] * CONFIG["attn_heads"]    # 32
NUM_HEADS = CONFIG["attn_heads"]                         # 2
HEAD_DIM = HIDDEN // NUM_HEADS                           # 16
FF = CONFIG["feed_forward_hidden"]                       # 128
N_LAYERS = CONFIG["num_layers"]                          # 2
LN_EPS = 1e-5
OUTPUT_ATTN = CONFIG["output_self_attention"]

BATCH = 2
SEQ = 8

VEC_LANES = 128          # packed small-parameter row width (FF=128 and 3*H=96 both fit)
assert FF <= VEC_LANES and 3 * HIDDEN <= VEC_LANES


# ---------------- LayerNorm helpers ----------------
def _layer_norm_fused(x, gamma, beta):
    """Single-pass statistics (E[x^2] - E[x]^2); fine in f32 at H=32."""
    mu = jnp.mean(x, axis=-1, keepdims=True)
    ms = jnp.mean(x * x, axis=-1, keepdims=True)
    var = ms - mu * mu
    return (x - mu) * lax.rsqrt(var + LN_EPS) * gamma + beta


def _layer_norm_ref(x, gamma, beta):
    mu = jnp.mean(x, axis=-1, keepdims=True)
    var = jnp.mean((x - mu) ** 2, axis=-1, keepdims=True)
    return (x - mu) * lax.rsqrt(var + LN_EPS) * gamma + beta


# ---------------- fused Pallas kernel (whole model, whole batch, one call) ----------------
def fused_bert_kernel(x_ref, mask_ref, vec_ref, wqkv_ref, wo_ref, w1_ref, w2_ref,
                      y_ref, *attn_refs):
    attn_ref = attn_refs[0] if attn_refs else None

    x = x_ref[...]                 # (B*S, H) f32 residual stream
    mask_add = mask_ref[...]       # (B*S, B*S) f32: 0 keep, -1e9 for cross-batch / masked key
    inv_sqrt_dk = 1.0 / math.sqrt(HEAD_DIM)

    for li in range(N_LAYERS):                     # static unroll over layers
        vl = vec_ref[li]                           # (8, 128) packed small params
        ln1_g, ln1_b = vl[0:1, :HIDDEN], vl[1:2, :HIDDEN]
        ln2_g, ln2_b = vl[2:3, :HIDDEN], vl[3:4, :HIDDEN]
        bo, b2 = vl[4:5, :HIDDEN], vl[5:6, :HIDDEN]
        bqkv = vl[6:7, :3 * HIDDEN]
        b1 = vl[7:8, :FF]

        # ---- attention sublayer: x = x + MHA(LayerNorm(x)) ----
        h = _layer_norm_fused(x, ln1_g, ln1_b)
        qkv = jnp.dot(h.astype(jnp.bfloat16), wqkv_ref[li],
                      preferred_element_type=jnp.float32) + bqkv       # (B*S, 3H)

        ctx_heads = []
        for hi in range(NUM_HEADS):                # static unroll over heads
            q = qkv[:, hi * HEAD_DIM:(hi + 1) * HEAD_DIM]
            k = qkv[:, HIDDEN + hi * HEAD_DIM:HIDDEN + (hi + 1) * HEAD_DIM]
            v = qkv[:, 2 * HIDDEN + hi * HEAD_DIM:2 * HIDDEN + (hi + 1) * HEAD_DIM]

            scores = jnp.dot(q, k.T, preferred_element_type=jnp.float32) * inv_sqrt_dk
            scores = scores + mask_add             # block-diagonal + key masking

            m = jnp.max(scores, axis=-1, keepdims=True)
            e = jnp.exp(scores - m)
            p = e / jnp.sum(e, axis=-1, keepdims=True)   # exact normalization

            if attn_ref is not None:
                attn_ref[li, hi] = p               # (B*S, B*S); per-batch blocks sliced outside

            ctx_heads.append(jnp.dot(p, v, preferred_element_type=jnp.float32))

        ctx = jnp.concatenate(ctx_heads, axis=-1)  # (B*S, H)
        x = x + jnp.dot(ctx.astype(jnp.bfloat16), wo_ref[li],
                        preferred_element_type=jnp.float32) + bo

        # ---- FFN sublayer: x = x + FFN(LayerNorm(x)) ----
        h2 = _layer_norm_fused(x, ln2_g, ln2_b)
        f = jnp.dot(h2.astype(jnp.bfloat16), w1_ref[li],
                    preferred_element_type=jnp.float32) + b1
        f = jax.nn.gelu(f, approximate=True)       # BERT tanh-approx GELU
        x = x + jnp.dot(f.astype(jnp.bfloat16), w2_ref[li],
                        preferred_element_type=jnp.float32) + b2

    y_ref[...] = x.astype(y_ref.dtype)


# ---------------- parameter packing ----------------
def _stack_params(layer_params):
    """Stack per-layer params, fuse QKV, cast matmul weights to bf16, and pack all
    small vectors into one (L, 8, 128) slab (rows: ln1_g, ln1_b, ln2_g, ln2_b,
    bo, b2, bqkv, b1)."""
    st = {k: jnp.stack([p[k] for p in layer_params], axis=0) for k in layer_params[0]}

    def pad_row(v):                                 # (L, 1, W) -> (L, 1, 128)
        return jnp.pad(v, ((0, 0), (0, 0), (0, VEC_LANES - v.shape[-1])))

    rows = [st["ln1_g"], st["ln1_b"], st["ln2_g"], st["ln2_b"], st["bo"], st["b2"],
            jnp.concatenate([st["bq"], st["bk"], st["bv"]], axis=-1), st["b1"]]
    vecs = jnp.concatenate([pad_row(r) for r in rows], axis=1).astype(jnp.float32)

    return dict(
        vecs=vecs,                                                          # (L, 8, 128) f32
        wqkv=jnp.concatenate([st["wq"], st["wk"], st["wv"]], axis=-1).astype(jnp.bfloat16),
        wo=st["wo"].astype(jnp.bfloat16),
        w1=st["w1"].astype(jnp.bfloat16),
        w2=st["w2"].astype(jnp.bfloat16),
    )


# ---------------- wrapper (single pallas_call, no grid) ----------------
def attention_model(inputs, attention_mask, layer_params):
    """Mirrors AttentionModel.forward: whole stack fused into one kernel call."""
    x = inputs["event_representation"]
    B, S, H = x.shape
    L = len(layer_params)
    BS = B * S

    x2d = x.reshape(BS, H).astype(jnp.float32)

    # additive mask over the folded (B*S, B*S) score matrix:
    #   0 where query and key are in the same batch AND key is not masked, else -1e9
    batch_idx = jnp.repeat(jnp.arange(B), S)
    key_ok = attention_mask.reshape(BS) != 0
    keep = (batch_idx[:, None] == batch_idx[None, :]) & key_ok[None, :]
    mask_add = jnp.where(keep, 0.0, -1e9).astype(jnp.float32)

    sp = _stack_params(layer_params)

    out_shapes = [jax.ShapeDtypeStruct((BS, H), jnp.float32)]
    if OUTPUT_ATTN:
        out_shapes.append(jax.ShapeDtypeStruct((L, NUM_HEADS, BS, BS), jnp.float32))

    outs = pl.pallas_call(
        fused_bert_kernel,
        out_shape=tuple(out_shapes),
    )(x2d, mask_add, sp["vecs"], sp["wqkv"], sp["wo"], sp["w1"], sp["w2"])

    y = outs[0].reshape(B, S, H)
    if OUTPUT_ATTN:
        attn_full = outs[1]                           # (L, NH, B*S, B*S), block-diagonal
        attn_layers = tuple(
            jnp.stack([attn_full[li, :, b * S:(b + 1) * S, b * S:(b + 1) * S]
                       for b in range(B)], axis=0)    # (B, NH, S, S)
            for li in range(L))
        return y, attn_layers
    return y, []


# ---------------- pure-JAX reference (for correctness check) ----------------
def reference_model(x, attention_mask, layer_params):
    mask = attention_mask.astype(jnp.float32)[:, None, None, :]     # (B, 1, 1, S)
    attn_all = []
    for p in layer_params:
        h = _layer_norm_ref(x, p["ln1_g"], p["ln1_b"])

        def proj(w, b):
            y = jnp.einsum("bsh,hd->bsd", h, w) + b
            Bq, Sq, _ = y.shape
            return y.reshape(Bq, Sq, NUM_HEADS, HEAD_DIM).transpose(0, 2, 1, 3)

        q, k, v = proj(p["wq"], p["bq"]), proj(p["wk"], p["bk"]), proj(p["wv"], p["bv"])
        scores = jnp.einsum("bnqd,bnkd->bnqk", q, k) / math.sqrt(HEAD_DIM)
        scores = jnp.where(mask == 0.0, -1e9, scores)
        pr = jax.nn.softmax(scores, axis=-1)
        ctx = jnp.einsum("bnqk,bnkd->bnqd", pr, v).transpose(0, 2, 1, 3).reshape(x.shape)
        x = x + jnp.einsum("bsh,hd->bsd", ctx, p["wo"]) + p["bo"]

        h2 = _layer_norm_ref(x, p["ln2_g"], p["ln2_b"])
        f = jax.nn.gelu(jnp.einsum("bsh,hf->bsf", h2, p["w1"]) + p["b1"], approximate=True)
        x = x + jnp.einsum("bsf,fh->bsh", f, p["w2"]) + p["b2"]
        attn_all.append(pr)
    return x, tuple(attn_all)


# ---------------- deterministic parameter init ----------------
def init_layer_params(key):
    ks = jax.random.split(key, 8)

    def xavier(k, shape):
        fan_in, fan_out = shape
        std = math.sqrt(2.0 / (fan_in + fan_out))
        return (std * jax.random.normal(k, shape)).astype(jnp.float32)

    return dict(
        ln1_g=jnp.ones((1, HIDDEN), jnp.float32),
        ln1_b=jnp.zeros((1, HIDDEN), jnp.float32),
        wq=xavier(ks[0], (HIDDEN, HIDDEN)), bq=jnp.zeros((1, HIDDEN), jnp.float32),
        wk=xavier(ks[1], (HIDDEN, HIDDEN)), bk=jnp.zeros((1, HIDDEN), jnp.float32),
        wv=xavier(ks[2], (HIDDEN, HIDDEN)), bv=jnp.zeros((1, HIDDEN), jnp.float32),
        wo=xavier(ks[3], (HIDDEN, HIDDEN)), bo=jnp.zeros((1, HIDDEN), jnp.float32),
        ln2_g=jnp.ones((1, HIDDEN), jnp.float32),
        ln2_b=jnp.zeros((1, HIDDEN), jnp.float32),
        w1=xavier(ks[4], (HIDDEN, FF)), b1=jnp.zeros((1, FF), jnp.float32),
        w2=xavier(ks[5], (FF, HIDDEN)), b2=jnp.zeros((1, HIDDEN), jnp.float32),
    )


# ---------------- main ----------------
if __name__ == "__main__":
    root = jax.random.PRNGKey(0)
    k_x, k_params = jax.random.split(root)

    # event_representation: (B, S, H); attention mask: (B, S), batch 1 has padding.
    x = jax.random.normal(k_x, (BATCH, SEQ, HIDDEN), dtype=jnp.float32)
    attention_mask = jnp.array(
        [[1] * SEQ,
         [1] * 5 + [0] * (SEQ - 5)], dtype=jnp.int32)

    layer_keys = jax.random.split(k_params, N_LAYERS)
    layer_params = [init_layer_params(k) for k in layer_keys]

    fwd = jax.jit(attention_model)
    out, attn_stack = fwd({"event_representation": x}, attention_mask, layer_params)

    out = jax.block_until_ready(out)
    attn_stack = jax.block_until_ready(attn_stack)

    assert out.shape == (BATCH, SEQ, HIDDEN)
    assert len(attn_stack) == N_LAYERS
    assert attn_stack[0].shape == (BATCH, NUM_HEADS, SEQ, SEQ)
    assert bool(jnp.all(jnp.isfinite(out)))
    # masked key positions must get ~zero attention probability
    assert float(jnp.max(attn_stack[0][1, :, :, 5:])) < 1e-6
    # softmax rows must normalize to 1 (exact division in kernel)
    row_sums = jnp.sum(attn_stack[0], axis=-1)
    assert float(jnp.max(jnp.abs(row_sums - 1.0))) < 1e-3

    # numerical parity vs. pure-JAX f32 reference; slack covers bf16 weight quantization
    out_ref, _ = reference_model(x, attention_mask, layer_params)
    assert bool(jnp.allclose(out, out_ref, atol=5e-2, rtol=5e-2))

    print("KERNEL_OK")
</pallas_src>

<mosaic_0001>
module attributes {stable_mosaic.version = 11 : i64} {
  func.func @fused_bert_kernel(%arg0: memref<16x32xf32, #tpu.memory_space<vmem>>, %arg1: memref<16x16xf32, #tpu.memory_space<vmem>>, %arg2: memref<2x8x128xf32, #tpu.memory_space<vmem>>, %arg3: memref<2x32x96xbf16, #tpu.memory_space<vmem>>, %arg4: memref<2x32x32xbf16, #tpu.memory_space<vmem>>, %arg5: memref<2x32x128xbf16, #tpu.memory_space<vmem>>, %arg6: memref<2x128x32xbf16, #tpu.memory_space<vmem>>, %arg7: memref<16x32xf32, #tpu.memory_space<vmem>>, %arg8: memref<2x2x16x16xf32, #tpu.memory_space<vmem>>) attributes {dimension_semantics = [], scalar_prefetch = 0 : i64, scratch_operands = 0 : i64, tpu.core_type = #tpu.core_type<tc>} {
    %c0 = arith.constant 0 : index
    %c0_0 = arith.constant 0 : index
    %0 = vector.load %arg0[%c0, %c0_0] : memref<16x32xf32, #tpu.memory_space<vmem>>, vector<16x32xf32>
    %c0_1 = arith.constant 0 : index
    %c0_2 = arith.constant 0 : index
    %1 = vector.load %arg1[%c0_1, %c0_2] : memref<16x16xf32, #tpu.memory_space<vmem>>, vector<16x16xf32>
    %c0_3 = arith.constant 0 : index
    %c0_4 = arith.constant 0 : index
    %c0_5 = arith.constant 0 : index
    %2 = vector.load %arg2[%c0_3, %c0_4, %c0_5] : memref<2x8x128xf32, #tpu.memory_space<vmem>>, vector<1x8x128xf32>
    %3 = vector.shape_cast %2 : vector<1x8x128xf32> to vector<8x128xf32>
    %4 = vector.extract_strided_slice %3 {offsets = [0, 0], sizes = [1, 32], strides = [1, 1]} : vector<8x128xf32> to vector<1x32xf32>
    %5 = vector.extract_strided_slice %3 {offsets = [1, 0], sizes = [1, 32], strides = [1, 1]} : vector<8x128xf32> to vector<1x32xf32>
    %6 = vector.extract_strided_slice %3 {offsets = [2, 0], sizes = [1, 32], strides = [1, 1]} : vector<8x128xf32> to vector<1x32xf32>
    %7 = vector.extract_strided_slice %3 {offsets = [3, 0], sizes = [1, 32], strides = [1, 1]} : vector<8x128xf32> to vector<1x32xf32>
    %8 = vector.extract_strided_slice %3 {offsets = [4, 0], sizes = [1, 32], strides = [1, 1]} : vector<8x128xf32> to vector<1x32xf32>
    %9 = vector.extract_strided_slice %3 {offsets = [5, 0], sizes = [1, 32], strides = [1, 1]} : vector<8x128xf32> to vector<1x32xf32>
    %10 = vector.extract_strided_slice %3 {offsets = [6, 0], sizes = [1, 96], strides = [1, 1]} : vector<8x128xf32> to vector<1x96xf32>
    %11 = vector.extract_strided_slice %3 {offsets = [7, 0], sizes = [1, 128], strides = [1, 1]} : vector<8x128xf32> to vector<1x128xf32>
    %cst = arith.constant dense<0.000000e+00> : vector<16xf32>
    %12 = vector.multi_reduction <add>, %0, %cst [1] : vector<16x32xf32> to vector<16xf32>
    %13 = vector.shape_cast %12 : vector<16xf32> to vector<16x1xf32>
    %cst_6 = arith.constant 3.200000e+01 : f32
    %14 = vector.broadcast %cst_6 : f32 to vector<16x1xf32>
    %15 = arith.divf %13, %14 : vector<16x1xf32>
    %16 = arith.mulf %0, %0 : vector<16x32xf32>
    %cst_7 = arith.constant dense<0.000000e+00> : vector<16xf32>
    %17 = vector.multi_reduction <add>, %16, %cst_7 [1] : vector<16x32xf32> to vector<16xf32>
    %18 = vector.shape_cast %17 : vector<16xf32> to vector<16x1xf32>
    %cst_8 = arith.constant 3.200000e+01 : f32
    %19 = vector.broadcast %cst_8 : f32 to vector<16x1xf32>
    %20 = arith.divf %18, %19 : vector<16x1xf32>
    %21 = arith.mulf %15, %15 : vector<16x1xf32>
    %22 = arith.subf %20, %21 : vector<16x1xf32>
    %23 = vector.broadcast %15 : vector<16x1xf32> to vector<16x32xf32>
    %24 = arith.subf %0, %23 : vector<16x32xf32>
    %cst_9 = arith.constant 9.99999974E-6 : f32
    %25 = vector.broadcast %cst_9 : f32 to vector<16x1xf32>
    %26 = arith.addf %22, %25 : vector<16x1xf32>
    %27 = math.rsqrt %26 : vector<16x1xf32>
    %28 = vector.broadcast %27 : vector<16x1xf32> to vector<16x32xf32>
    %29 = arith.mulf %24, %28 : vector<16x32xf32>
    %30 = vector.broadcast %4 : vector<1x32xf32> to vector<16x32xf32>
    %31 = arith.mulf %29, %30 : vector<16x32xf32>
    %32 = vector.broadcast %5 : vector<1x32xf32> to vector<16x32xf32>
    %33 = arith.addf %31, %32 : vector<16x32xf32>
    %34 = arith.truncf %33 : vector<16x32xf32> to vector<16x32xbf16>
    %c0_10 = arith.constant 0 : index
    %c0_11 = arith.constant 0 : index
    %c0_12 = arith.constant 0 : index
    %35 = vector.load %arg3[%c0_10, %c0_11, %c0_12] : memref<2x32x96xbf16, #tpu.memory_space<vmem>>, vector<1x32x96xbf16>
    %36 = vector.shape_cast %35 : vector<1x32x96xbf16> to vector<32x96xbf16>
    %cst_13 = arith.constant dense<0.000000e+00> : vector<16x96xf32>
    %37 = tpu.matmul %34, %36, %cst_13 {dimension_numbers = #tpu.dot_dimension_numbers<[1], [0], [0], [1], [0, 0, 1, 1], [], []>} : vector<16x32xbf16>, vector<32x96xbf16>, vector<16x96xf32> -> vector<16x96xf32>
    %38 = vector.broadcast %10 : vector<1x96xf32> to vector<16x96xf32>
    %39 = arith.addf %37, %38 : vector<16x96xf32>
    %40 = vector.extract_strided_slice %39 {offsets = [0, 0], sizes = [16, 16], strides = [1, 1]} : vector<16x96xf32> to vector<16x16xf32>
    %41 = vector.extract_strided_slice %39 {offsets = [0, 32], sizes = [16, 16], strides = [1, 1]} : vector<16x96xf32> to vector<16x16xf32>
    %42 = vector.extract_strided_slice %39 {offsets = [0, 64], sizes = [16, 16], strides = [1, 1]} : vector<16x96xf32> to vector<16x16xf32>
    %43 = tpu.transpose %41, [1, 0] : vector<16x16xf32> -> vector<16x16xf32>
    %cst_14 = arith.constant dense<0.000000e+00> : vector<16x16xf32>
    %44 = tpu.matmul %40, %43, %cst_14 {dimension_numbers = #tpu.dot_dimension_numbers<[1], [0], [0], [1], [0, 0, 1, 1], [], []>} : vector<16x16xf32>, vector<16x16xf32>, vector<16x16xf32> -> vector<16x16xf32>
    %cst_15 = arith.constant 2.500000e-01 : f32
    %45 = vector.broadcast %cst_15 : f32 to vector<16x16xf32>
    %46 = arith.mulf %44, %45 : vector<16x16xf32>
    %47 = arith.addf %46, %1 : vector<16x16xf32>
    %cst_16 = arith.constant dense<0xFF800000> : vector<16xf32>
    %48 = vector.multi_reduction <maximumf>, %47, %cst_16 [1] : vector<16x16xf32> to vector<16xf32>
    %49 = vector.shape_cast %48 : vector<16xf32> to vector<16x1xf32>
    %50 = vector.broadcast %49 : vector<16x1xf32> to vector<16x16xf32>
    %51 = arith.subf %47, %50 : vector<16x16xf32>
    %52 = math.exp %51 : vector<16x16xf32>
    %cst_17 = arith.constant dense<0.000000e+00> : vector<16xf32>
    %53 = vector.multi_reduction <add>, %52, %cst_17 [1] : vector<16x16xf32> to vector<16xf32>
    %54 = vector.shape_cast %53 : vector<16xf32> to vector<16x1xf32>
    %55 = vector.broadcast %54 : vector<16x1xf32> to vector<16x16xf32>
    %56 = arith.divf %52, %55 : vector<16x16xf32>
    %c0_18 = arith.constant 0 : index
    %c0_19 = arith.constant 0 : index
    %c0_20 = arith.constant 0 : index
    %c0_21 = arith.constant 0 : index
    %57 = vector.load %arg8[%c0_18, %c0_19, %c0_20, %c0_21] : memref<2x2x16x16xf32, #tpu.memory_space<vmem>>, vector<1x1x16x16xf32>
    %58 = vector.shape_cast %57 : vector<1x1x16x16xf32> to vector<16x16xf32>
    %59 = vector.shape_cast %56 : vector<16x16xf32> to vector<1x1x16x16xf32>
    tpu.vector_store %arg8[%c0_18, %c0_19, %c0_20, %c0_21], %59 {strides = array<i32>} : memref<2x2x16x16xf32, #tpu.memory_space<vmem>>, vector<1x1x16x16xf32>,
    %cst_22 = arith.constant dense<0.000000e+00> : vector<16x16xf32>
    %60 = tpu.matmul %56, %42, %cst_22 {dimension_numbers = #tpu.dot_dimension_numbers<[1], [0], [0], [1], [0, 0, 1, 1], [], []>} : vector<16x16xf32>, vector<16x16xf32>, vector<16x16xf32> -> vector<16x16xf32>
    %61 = vector.extract_strided_slice %39 {offsets = [0, 16], sizes = [16, 16], strides = [1, 1]} : vector<16x96xf32> to vector<16x16xf32>
    %62 = vector.extract_strided_slice %39 {offsets = [0, 48], sizes = [16, 16], strides = [1, 1]} : vector<16x96xf32> to vector<16x16xf32>
    %63 = vector.extract_strided_slice %39 {offsets = [0, 80], sizes = [16, 16], strides = [1, 1]} : vector<16x96xf32> to vector<16x16xf32>
    %64 = tpu.transpose %62, [1, 0] : vector<16x16xf32> -> vector<16x16xf32>
    %cst_23 = arith.constant dense<0.000000e+00> : vector<16x16xf32>
    %65 = tpu.matmul %61, %64, %cst_23 {dimension_numbers = #tpu.dot_dimension_numbers<[1], [0], [0], [1], [0, 0, 1, 1], [], []>} : vector<16x16xf32>, vector<16x16xf32>, vector<16x16xf32> -> vector<16x16xf32>
    %cst_24 = arith.constant 2.500000e-01 : f32
    %66 = vector.broadcast %cst_24 : f32 to vector<16x16xf32>
    %67 = arith.mulf %65, %66 : vector<16x16xf32>
    %68 = arith.addf %67, %1 : vector<16x16xf32>
    %cst_25 = arith.constant dense<0xFF800000> : vector<16xf32>
    %69 = vector.multi_reduction <maximumf>, %68, %cst_25 [1] : vector<16x16xf32> to vector<16xf32>
    %70 = vector.shape_cast %69 : vector<16xf32> to vector<16x1xf32>
    %71 = vector.broadcast %70 : vector<16x1xf32> to vector<16x16xf32>
    %72 = arith.subf %68, %71 : vector<16x16xf32>
    %73 = math.exp %72 : vector<16x16xf32>
    %cst_26 = arith.constant dense<0.000000e+00> : vector<16xf32>
    %74 = vector.multi_reduction <add>, %73, %cst_26 [1] : vector<16x16xf32> to vector<16xf32>
    %75 = vector.shape_cast %74 : vector<16xf32> to vector<16x1xf32>
    %76 = vector.broadcast %75 : vector<16x1xf32> to vector<16x16xf32>
    %77 = arith.divf %73, %76 : vector<16x16xf32>
    %c0_27 = arith.constant 0 : index
    %c1 = arith.constant 1 : index
    %c0_28 = arith.constant 0 : index
    %c0_29 = arith.constant 0 : index
    %78 = vector.load %arg8[%c0_27, %c1, %c0_28, %c0_29] : memref<2x2x16x16xf32, #tpu.memory_space<vmem>>, vector<1x1x16x16xf32>
    %79 = vector.shape_cast %78 : vector<1x1x16x16xf32> to vector<16x16xf32>
    %80 = vector.shape_cast %77 : vector<16x16xf32> to vector<1x1x16x16xf32>
    tpu.vector_store %arg8[%c0_27, %c1, %c0_28, %c0_29], %80 {strides = array<i32>} : memref<2x2x16x16xf32, #tpu.memory_space<vmem>>, vector<1x1x16x16xf32>,
    %cst_30 = arith.constant dense<0.000000e+00> : vector<16x16xf32>
    %81 = tpu.matmul %77, %63, %cst_30 {dimension_numbers = #tpu.dot_dimension_numbers<[1], [0], [0], [1], [0, 0, 1, 1], [], []>} : vector<16x16xf32>, vector<16x16xf32>, vector<16x16xf32> -> vector<16x16xf32>
    %82 = tpu.concatenate %60, %81 in 1 : vector<16x16xf32>, vector<16x16xf32> -> vector<16x32xf32>
    %83 = arith.truncf %82 : vector<16x32xf32> to vector<16x32xbf16>
    %c0_31 = arith.constant 0 : index
    %c0_32 = arith.constant 0 : index
    %c0_33 = arith.constant 0 : index
    %84 = vector.load %arg4[%c0_31, %c0_32, %c0_33] : memref<2x32x32xbf16, #tpu.memory_space<vmem>>, vector<1x32x32xbf16>
    %85 = vector.shape_cast %84 : vector<1x32x32xbf16> to vector<32x32xbf16>
    %cst_34 = arith.constant dense<0.000000e+00> : vector<16x32xf32>
    %86 = tpu.matmul %83, %85, %cst_34 {dimension_numbers = #tpu.dot_dimension_numbers<[1], [0], [0], [1], [0, 0, 1, 1], [], []>} : vector<16x32xbf16>, vector<32x32xbf16>, vector<16x32xf32> -> vector<16x32xf32>
    %87 = arith.addf %0, %86 : vector<16x32xf32>
    %88 = vector.broadcast %8 : vector<1x32xf32> to vector<16x32xf32>
    %89 = arith.addf %87, %88 : vector<16x32xf32>
    %cst_35 = arith.constant dense<0.000000e+00> : vector<16xf32>
    %90 = vector.multi_reduction <add>, %89, %cst_35 [1] : vector<16x32xf32> to vector<16xf32>
    %91 = vector.shape_cast %90 : vector<16xf32> to vector<16x1xf32>
    %cst_36 = arith.constant 3.200000e+01 : f32
    %92 = vector.broadcast %cst_36 : f32 to vector<16x1xf32>
    %93 = arith.divf %91, %92 : vector<16x1xf32>
    %94 = arith.mulf %89, %89 : vector<16x32xf32>
    %cst_37 = arith.constant dense<0.000000e+00> : vector<16xf32>
    %95 = vector.multi_reduction <add>, %94, %cst_37 [1] : vector<16x32xf32> to vector<16xf32>
    %96 = vector.shape_cast %95 : vector<16xf32> to vector<16x1xf32>
    %cst_38 = arith.constant 3.200000e+01 : f32
    %97 = vector.broadcast %cst_38 : f32 to vector<16x1xf32>
    %98 = arith.divf %96, %97 : vector<16x1xf32>
    %99 = arith.mulf %93, %93 : vector<16x1xf32>
    %100 = arith.subf %98, %99 : vector<16x1xf32>
    %101 = vector.broadcast %93 : vector<16x1xf32> to vector<16x32xf32>
    %102 = arith.subf %89, %101 : vector<16x32xf32>
    %cst_39 = arith.constant 9.99999974E-6 : f32
    %103 = vector.broadcast %cst_39 : f32 to vector<16x1xf32>
    %104 = arith.addf %100, %103 : vector<16x1xf32>
    %105 = math.rsqrt %104 : vector<16x1xf32>
    %106 = vector.broadcast %105 : vector<16x1xf32> to vector<16x32xf32>
    %107 = arith.mulf %102, %106 : vector<16x32xf32>
    %108 = vector.broadcast %6 : vector<1x32xf32> to vector<16x32xf32>
    %109 = arith.mulf %107, %108 : vector<16x32xf32>
    %110 = vector.broadcast %7 : vector<1x32xf32> to vector<16x32xf32>
    %111 = arith.addf %109, %110 : vector<16x32xf32>
    %112 = arith.truncf %111 : vector<16x32xf32> to vector<16x32xbf16>
    %c0_40 = arith.constant 0 : index
    %c0_41 = arith.constant 0 : index
    %c0_42 = arith.constant 0 : index
    %113 = vector.load %arg5[%c0_40, %c0_41, %c0_42] : memref<2x32x128xbf16, #tpu.memory_space<vmem>>, vector<1x32x128xbf16>
    %114 = vector.shape_cast %113 : vector<1x32x128xbf16> to vector<32x128xbf16>
    %cst_43 = arith.constant dense<0.000000e+00> : vector<16x128xf32>
    %115 = tpu.matmul %112, %114, %cst_43 {dimension_numbers = #tpu.dot_dimension_numbers<[1], [0], [0], [1], [0, 0, 1, 1], [], []>} : vector<16x32xbf16>, vector<32x128xbf16>, vector<16x128xf32> -> vector<16x128xf32>
    %116 = vector.broadcast %11 : vector<1x128xf32> to vector<16x128xf32>
    %117 = arith.addf %115, %116 : vector<16x128xf32>
    %118 = arith.mulf %117, %117 : vector<16x128xf32>
    %119 = arith.mulf %117, %118 : vector<16x128xf32>
    %cst_44 = arith.constant 4.471500e-02 : f32
    %120 = vector.broadcast %cst_44 : f32 to vector<16x128xf32>
    %121 = arith.mulf %120, %119 : vector<16x128xf32>
    %122 = arith.addf %117, %121 : vector<16x128xf32>
    %cst_45 = arith.constant 0.797884583 : f32
    %123 = vector.broadcast %cst_45 : f32 to vector<16x128xf32>
    %124 = arith.mulf %123, %122 : vector<16x128xf32>
    %125 = math.tanh %124 : vector<16x128xf32>
    %cst_46 = arith.constant 1.000000e+00 : f32
    %126 = vector.broadcast %cst_46 : f32 to vector<16x128xf32>
    %127 = arith.addf %126, %125 : vector<16x128xf32>
    %cst_47 = arith.constant 5.000000e-01 : f32
    %128 = vector.broadcast %cst_47 : f32 to vector<16x128xf32>
    %129 = arith.mulf %128, %127 : vector<16x128xf32>
    %130 = arith.mulf %117, %129 : vector<16x128xf32>
    %131 = arith.truncf %130 : vector<16x128xf32> to vector<16x128xbf16>
    %c0_48 = arith.constant 0 : index
    %c0_49 = arith.constant 0 : index
    %c0_50 = arith.constant 0 : index
    %132 = vector.load %arg6[%c0_48, %c0_49, %c0_50] : memref<2x128x32xbf16, #tpu.memory_space<vmem>>, vector<1x128x32xbf16>
    %133 = vector.shape_cast %132 : vector<1x128x32xbf16> to vector<128x32xbf16>
    %cst_51 = arith.constant dense<0.000000e+00> : vector<16x32xf32>
    %134 = tpu.matmul %131, %133, %cst_51 {dimension_numbers = #tpu.dot_dimension_numbers<[1], [0], [0], [1], [0, 0, 1, 1], [], []>} : vector<16x128xbf16>, vector<128x32xbf16>, vector<16x32xf32> -> vector<16x32xf32>
    %135 = arith.addf %89, %134 : vector<16x32xf32>
    %136 = vector.broadcast %9 : vector<1x32xf32> to vector<16x32xf32>
    %137 = arith.addf %135, %136 : vector<16x32xf32>
    %c1_52 = arith.constant 1 : index
    %c0_53 = arith.constant 0 : index
    %c0_54 = arith.constant 0 : index
    %138 = vector.load %arg2[%c1_52, %c0_53, %c0_54] : memref<2x8x128xf32, #tpu.memory_space<vmem>>, vector<1x8x128xf32>
    %139 = vector.shape_cast %138 : vector<1x8x128xf32> to vector<8x128xf32>
    %140 = vector.extract_strided_slice %139 {offsets = [0, 0], sizes = [1, 32], strides = [1, 1]} : vector<8x128xf32> to vector<1x32xf32>
    %141 = vector.extract_strided_slice %139 {offsets = [1, 0], sizes = [1, 32], strides = [1, 1]} : vector<8x128xf32> to vector<1x32xf32>
    %142 = vector.extract_strided_slice %139 {offsets = [2, 0], sizes = [1, 32], strides = [1, 1]} : vector<8x128xf32> to vector<1x32xf32>
    %143 = vector.extract_strided_slice %139 {offsets = [3, 0], sizes = [1, 32], strides = [1, 1]} : vector<8x128xf32> to vector<1x32xf32>
    %144 = vector.extract_strided_slice %139 {offsets = [4, 0], sizes = [1, 32], strides = [1, 1]} : vector<8x128xf32> to vector<1x32xf32>
    %145 = vector.extract_strided_slice %139 {offsets = [5, 0], sizes = [1, 32], strides = [1, 1]} : vector<8x128xf32> to vector<1x32xf32>
    %146 = vector.extract_strided_slice %139 {offsets = [6, 0], sizes = [1, 96], strides = [1, 1]} : vector<8x128xf32> to vector<1x96xf32>
    %147 = vector.extract_strided_slice %139 {offsets = [7, 0], sizes = [1, 128], strides = [1, 1]} : vector<8x128xf32> to vector<1x128xf32>
    %cst_55 = arith.constant dense<0.000000e+00> : vector<16xf32>
    %148 = vector.multi_reduction <add>, %137, %cst_55 [1] : vector<16x32xf32> to vector<16xf32>
    %149 = vector.shape_cast %148 : vector<16xf32> to vector<16x1xf32>
    %cst_56 = arith.constant 3.200000e+01 : f32
    %150 = vector.broadcast %cst_56 : f32 to vector<16x1xf32>
    %151 = arith.divf %149, %150 : vector<16x1xf32>
    %152 = arith.mulf %137, %137 : vector<16x32xf32>
    %cst_57 = arith.constant dense<0.000000e+00> : vector<16xf32>
    %153 = vector.multi_reduction <add>, %152, %cst_57 [1] : vector<16x32xf32> to vector<16xf32>
    %154 = vector.shape_cast %153 : vector<16xf32> to vector<16x1xf32>
    %cst_58 = arith.constant 3.200000e+01 : f32
    %155 = vector.broadcast %cst_58 : f32 to vector<16x1xf32>
    %156 = arith.divf %154, %155 : vector<16x1xf32>
    %157 = arith.mulf %151, %151 : vector<16x1xf32>
    %158 = arith.subf %156, %157 : vector<16x1xf32>
    %159 = vector.broadcast %151 : vector<16x1xf32> to vector<16x32xf32>
    %160 = arith.subf %137, %159 : vector<16x32xf32>
    %cst_59 = arith.constant 9.99999974E-6 : f32
    %161 = vector.broadcast %cst_59 : f32 to vector<16x1xf32>
    %162 = arith.addf %158, %161 : vector<16x1xf32>
    %163 = math.rsqrt %162 : vector<16x1xf32>
    %164 = vector.broadcast %163 : vector<16x1xf32> to vector<16x32xf32>
    %165 = arith.mulf %160, %164 : vector<16x32xf32>
    %166 = vector.broadcast %140 : vector<1x32xf32> to vector<16x32xf32>
    %167 = arith.mulf %165, %166 : vector<16x32xf32>
    %168 = vector.broadcast %141 : vector<1x32xf32> to vector<16x32xf32>
    %169 = arith.addf %167, %168 : vector<16x32xf32>
    %170 = arith.truncf %169 : vector<16x32xf32> to vector<16x32xbf16>
    %c1_60 = arith.constant 1 : index
    %c0_61 = arith.constant 0 : index
    %c0_62 = arith.constant 0 : index
    %171 = vector.load %arg3[%c1_60, %c0_61, %c0_62] : memref<2x32x96xbf16, #tpu.memory_space<vmem>>, vector<1x32x96xbf16>
    %172 = vector.shape_cast %171 : vector<1x32x96xbf16> to vector<32x96xbf16>
    %cst_63 = arith.constant dense<0.000000e+00> : vector<16x96xf32>
    %173 = tpu.matmul %170, %172, %cst_63 {dimension_numbers = #tpu.dot_dimension_numbers<[1], [0], [0], [1], [0, 0, 1, 1], [], []>} : vector<16x32xbf16>, vector<32x96xbf16>, vector<16x96xf32> -> vector<16x96xf32>
    %174 = vector.broadcast %146 : vector<1x96xf32> to vector<16x96xf32>
    %175 = arith.addf %173, %174 : vector<16x96xf32>
    %176 = vector.extract_strided_slice %175 {offsets = [0, 0], sizes = [16, 16], strides = [1, 1]} : vector<16x96xf32> to vector<16x16xf32>
    %177 = vector.extract_strided_slice %175 {offsets = [0, 32], sizes = [16, 16], strides = [1, 1]} : vector<16x96xf32> to vector<16x16xf32>
    %178 = vector.extract_strided_slice %175 {offsets = [0, 64], sizes = [16, 16], strides = [1, 1]} : vector<16x96xf32> to vector<16x16xf32>
    %179 = tpu.transpose %177, [1, 0] : vector<16x16xf32> -> vector<16x16xf32>
    %cst_64 = arith.constant dense<0.000000e+00> : vector<16x16xf32>
    %180 = tpu.matmul %176, %179, %cst_64 {dimension_numbers = #tpu.dot_dimension_numbers<[1], [0], [0], [1], [0, 0, 1, 1], [], []>} : vector<16x16xf32>, vector<16x16xf32>, vector<16x16xf32> -> vector<16x16xf32>
    %cst_65 = arith.constant 2.500000e-01 : f32
    %181 = vector.broadcast %cst_65 : f32 to vector<16x16xf32>
    %182 = arith.mulf %180, %181 : vector<16x16xf32>
    %183 = arith.addf %182, %1 : vector<16x16xf32>
    %cst_66 = arith.constant dense<0xFF800000> : vector<16xf32>
    %184 = vector.multi_reduction <maximumf>, %183, %cst_66 [1] : vector<16x16xf32> to vector<16xf32>
    %185 = vector.shape_cast %184 : vector<16xf32> to vector<16x1xf32>
    %186 = vector.broadcast %185 : vector<16x1xf32> to vector<16x16xf32>
    %187 = arith.subf %183, %186 : vector<16x16xf32>
    %188 = math.exp %187 : vector<16x16xf32>
    %cst_67 = arith.constant dense<0.000000e+00> : vector<16xf32>
    %189 = vector.multi_reduction <add>, %188, %cst_67 [1] : vector<16x16xf32> to vector<16xf32>
    %190 = vector.shape_cast %189 : vector<16xf32> to vector<16x1xf32>
    %191 = vector.broadcast %190 : vector<16x1xf32> to vector<16x16xf32>
    %192 = arith.divf %188, %191 : vector<16x16xf32>
    %c1_68 = arith.constant 1 : index
    %c0_69 = arith.constant 0 : index
    %c0_70 = arith.constant 0 : index
    %c0_71 = arith.constant 0 : index
    %193 = vector.load %arg8[%c1_68, %c0_69, %c0_70, %c0_71] : memref<2x2x16x16xf32, #tpu.memory_space<vmem>>, vector<1x1x16x16xf32>
    %194 = vector.shape_cast %193 : vector<1x1x16x16xf32> to vector<16x16xf32>
    %195 = vector.shape_cast %192 : vector<16x16xf32> to vector<1x1x16x16xf32>
    tpu.vector_store %arg8[%c1_68, %c0_69, %c0_70, %c0_71], %195 {strides = array<i32>} : memref<2x2x16x16xf32, #tpu.memory_space<vmem>>, vector<1x1x16x16xf32>,
    %cst_72 = arith.constant dense<0.000000e+00> : vector<16x16xf32>
    %196 = tpu.matmul %192, %178, %cst_72 {dimension_numbers = #tpu.dot_dimension_numbers<[1], [0], [0], [1], [0, 0, 1, 1], [], []>} : vector<16x16xf32>, vector<16x16xf32>, vector<16x16xf32> -> vector<16x16xf32>
    %197 = vector.extract_strided_slice %175 {offsets = [0, 16], sizes = [16, 16], strides = [1, 1]} : vector<16x96xf32> to vector<16x16xf32>
    %198 = vector.extract_strided_slice %175 {offsets = [0, 48], sizes = [16, 16], strides = [1, 1]} : vector<16x96xf32> to vector<16x16xf32>
    %199 = vector.extract_strided_slice %175 {offsets = [0, 80], sizes = [16, 16], strides = [1, 1]} : vector<16x96xf32> to vector<16x16xf32>
    %200 = tpu.transpose %198, [1, 0] : vector<16x16xf32> -> vector<16x16xf32>
    %cst_73 = arith.constant dense<0.000000e+00> : vector<16x16xf32>
    %201 = tpu.matmul %197, %200, %cst_73 {dimension_numbers = #tpu.dot_dimension_numbers<[1], [0], [0], [1], [0, 0, 1, 1], [], []>} : vector<16x16xf32>, vector<16x16xf32>, vector<16x16xf32> -> vector<16x16xf32>
    %cst_74 = arith.constant 2.500000e-01 : f32
    %202 = vector.broadcast %cst_74 : f32 to vector<16x16xf32>
    %203 = arith.mulf %201, %202 : vector<16x16xf32>
    %204 = arith.addf %203, %1 : vector<16x16xf32>
    %cst_75 = arith.constant dense<0xFF800000> : vector<16xf32>
    %205 = vector.multi_reduction <maximumf>, %204, %cst_75 [1] : vector<16x16xf32> to vector<16xf32>
    %206 = vector.shape_cast %205 : vector<16xf32> to vector<16x1xf32>
    %207 = vector.broadcast %206 : vector<16x1xf32> to vector<16x16xf32>
    %208 = arith.subf %204, %207 : vector<16x16xf32>
    %209 = math.exp %208 : vector<16x16xf32>
    %cst_76 = arith.constant dense<0.000000e+00> : vector<16xf32>
    %210 = vector.multi_reduction <add>, %209, %cst_76 [1] : vector<16x16xf32> to vector<16xf32>
    %211 = vector.shape_cast %210 : vector<16xf32> to vector<16x1xf32>
    %212 = vector.broadcast %211 : vector<16x1xf32> to vector<16x16xf32>
    %213 = arith.divf %209, %212 : vector<16x16xf32>
    %c1_77 = arith.constant 1 : index
    %c1_78 = arith.constant 1 : index
    %c0_79 = arith.constant 0 : index
    %c0_80 = arith.constant 0 : index
    %214 = vector.load %arg8[%c1_77, %c1_78, %c0_79, %c0_80] : memref<2x2x16x16xf32, #tpu.memory_space<vmem>>, vector<1x1x16x16xf32>
    %215 = vector.shape_cast %214 : vector<1x1x16x16xf32> to vector<16x16xf32>
    %216 = vector.shape_cast %213 : vector<16x16xf32> to vector<1x1x16x16xf32>
    tpu.vector_store %arg8[%c1_77, %c1_78, %c0_79, %c0_80], %216 {strides = array<i32>} : memref<2x2x16x16xf32, #tpu.memory_space<vmem>>, vector<1x1x16x16xf32>,
    %cst_81 = arith.constant dense<0.000000e+00> : vector<16x16xf32>
    %217 = tpu.matmul %213, %199, %cst_81 {dimension_numbers = #tpu.dot_dimension_numbers<[1], [0], [0], [1], [0, 0, 1, 1], [], []>} : vector<16x16xf32>, vector<16x16xf32>, vector<16x16xf32> -> vector<16x16xf32>
    %218 = tpu.concatenate %196, %217 in 1 : vector<16x16xf32>, vector<16x16xf32> -> vector<16x32xf32>
    %219 = arith.truncf %218 : vector<16x32xf32> to vector<16x32xbf16>
    %c1_82 = arith.constant 1 : index
    %c0_83 = arith.constant 0 : index
    %c0_84 = arith.constant 0 : index
    %220 = vector.load %arg4[%c1_82, %c0_83, %c0_84] : memref<2x32x32xbf16, #tpu.memory_space<vmem>>, vector<1x32x32xbf16>
    %221 = vector.shape_cast %220 : vector<1x32x32xbf16> to vector<32x32xbf16>
    %cst_85 = arith.constant dense<0.000000e+00> : vector<16x32xf32>
    %222 = tpu.matmul %219, %221, %cst_85 {dimension_numbers = #tpu.dot_dimension_numbers<[1], [0], [0], [1], [0, 0, 1, 1], [], []>} : vector<16x32xbf16>, vector<32x32xbf16>, vector<16x32xf32> -> vector<16x32xf32>
    %223 = arith.addf %137, %222 : vector<16x32xf32>
    %224 = vector.broadcast %144 : vector<1x32xf32> to vector<16x32xf32>
    %225 = arith.addf %223, %224 : vector<16x32xf32>
    %cst_86 = arith.constant dense<0.000000e+00> : vector<16xf32>
    %226 = vector.multi_reduction <add>, %225, %cst_86 [1] : vector<16x32xf32> to vector<16xf32>
    %227 = vector.shape_cast %226 : vector<16xf32> to vector<16x1xf32>
    %cst_87 = arith.constant 3.200000e+01 : f32
    %228 = vector.broadcast %cst_87 : f32 to vector<16x1xf32>
    %229 = arith.divf %227, %228 : vector<16x1xf32>
    %230 = arith.mulf %225, %225 : vector<16x32xf32>
    %cst_88 = arith.constant dense<0.000000e+00> : vector<16xf32>
    %231 = vector.multi_reduction <add>, %230, %cst_88 [1] : vector<16x32xf32> to vector<16xf32>
    %232 = vector.shape_cast %231 : vector<16xf32> to vector<16x1xf32>
    %cst_89 = arith.constant 3.200000e+01 : f32
    %233 = vector.broadcast %cst_89 : f32 to vector<16x1xf32>
    %234 = arith.divf %232, %233 : vector<16x1xf32>
    %235 = arith.mulf %229, %229 : vector<16x1xf32>
    %236 = arith.subf %234, %235 : vector<16x1xf32>
    %237 = vector.broadcast %229 : vector<16x1xf32> to vector<16x32xf32>
    %238 = arith.subf %225, %237 : vector<16x32xf32>
    %cst_90 = arith.constant 9.99999974E-6 : f32
    %239 = vector.broadcast %cst_90 : f32 to vector<16x1xf32>
    %240 = arith.addf %236, %239 : vector<16x1xf32>
    %241 = math.rsqrt %240 : vector<16x1xf32>
    %242 = vector.broadcast %241 : vector<16x1xf32> to vector<16x32xf32>
    %243 = arith.mulf %238, %242 : vector<16x32xf32>
    %244 = vector.broadcast %142 : vector<1x32xf32> to vector<16x32xf32>
    %245 = arith.mulf %243, %244 : vector<16x32xf32>
    %246 = vector.broadcast %143 : vector<1x32xf32> to vector<16x32xf32>
    %247 = arith.addf %245, %246 : vector<16x32xf32>
    %248 = arith.truncf %247 : vector<16x32xf32> to vector<16x32xbf16>
    %c1_91 = arith.constant 1 : index
    %c0_92 = arith.constant 0 : index
    %c0_93 = arith.constant 0 : index
    %249 = vector.load %arg5[%c1_91, %c0_92, %c0_93] : memref<2x32x128xbf16, #tpu.memory_space<vmem>>, vector<1x32x128xbf16>
    %250 = vector.shape_cast %249 : vector<1x32x128xbf16> to vector<32x128xbf16>
    %cst_94 = arith.constant dense<0.000000e+00> : vector<16x128xf32>
    %251 = tpu.matmul %248, %250, %cst_94 {dimension_numbers = #tpu.dot_dimension_numbers<[1], [0], [0], [1], [0, 0, 1, 1], [], []>} : vector<16x32xbf16>, vector<32x128xbf16>, vector<16x128xf32> -> vector<16x128xf32>
    %252 = vector.broadcast %147 : vector<1x128xf32> to vector<16x128xf32>
    %253 = arith.addf %251, %252 : vector<16x128xf32>
    %254 = arith.mulf %253, %253 : vector<16x128xf32>
    %255 = arith.mulf %253, %254 : vector<16x128xf32>
    %cst_95 = arith.constant 4.471500e-02 : f32
    %256 = vector.broadcast %cst_95 : f32 to vector<16x128xf32>
    %257 = arith.mulf %256, %255 : vector<16x128xf32>
    %258 = arith.addf %253, %257 : vector<16x128xf32>
    %cst_96 = arith.constant 0.797884583 : f32
    %259 = vector.broadcast %cst_96 : f32 to vector<16x128xf32>
    %260 = arith.mulf %259, %258 : vector<16x128xf32>
    %261 = math.tanh %260 : vector<16x128xf32>
    %cst_97 = arith.constant 1.000000e+00 : f32
    %262 = vector.broadcast %cst_97 : f32 to vector<16x128xf32>
    %263 = arith.addf %262, %261 : vector<16x128xf32>
    %cst_98 = arith.constant 5.000000e-01 : f32
    %264 = vector.broadcast %cst_98 : f32 to vector<16x128xf32>
    %265 = arith.mulf %264, %263 : vector<16x128xf32>
    %266 = arith.mulf %253, %265 : vector<16x128xf32>
    %267 = arith.truncf %266 : vector<16x128xf32> to vector<16x128xbf16>
    %c1_99 = arith.constant 1 : index
    %c0_100 = arith.constant 0 : index
    %c0_101 = arith.constant 0 : index
    %268 = vector.load %arg6[%c1_99, %c0_100, %c0_101] : memref<2x128x32xbf16, #tpu.memory_space<vmem>>, vector<1x128x32xbf16>
    %269 = vector.shape_cast %268 : vector<1x128x32xbf16> to vector<128x32xbf16>
    %cst_102 = arith.constant dense<0.000000e+00> : vector<16x32xf32>
    %270 = tpu.matmul %267, %269, %cst_102 {dimension_numbers = #tpu.dot_dimension_numbers<[1], [0], [0], [1], [0, 0, 1, 1], [], []>} : vector<16x128xbf16>, vector<128x32xbf16>, vector<16x32xf32> -> vector<16x32xf32>
    %271 = arith.addf %225, %270 : vector<16x32xf32>
    %272 = vector.broadcast %145 : vector<1x32xf32> to vector<16x32xf32>
    %273 = arith.addf %271, %272 : vector<16x32xf32>
    %c0_103 = arith.constant 0 : index
    %c0_104 = arith.constant 0 : index
    %274 = vector.load %arg7[%c0_103, %c0_104] : memref<16x32xf32, #tpu.memory_space<vmem>>, vector<16x32xf32>
    tpu.vector_store %arg7[%c0_103, %c0_104], %273 {strides = array<i32>} : memref<16x32xf32, #tpu.memory_space<vmem>>, vector<16x32xf32>,
    return
  }
}

</mosaic_0001>

<bundles_post_ra>
// kernel: eq.8
= control target key start
LH: loop header
LB: loop body
LE: loop exit
PB: predicated region body
PF: predicated region fallthrough
CT: control target
= control target key end

     0   :  { %vm7_vm0 = vcmask 64512   ;;  %vm13_vm1 = vcmask 130112   ;;  %s39_s0 = inlined_call_operand.vmem [shape: s32[2,8], index: 0, kind: input, shape index: {}]   ;;  %s40_s1 = inlined_call_operand.vmem [shape: s32[16], index: 1, kind: output, shape index: {}]  }
   0x1   :  { %v4_v0 = vld [vmem:[%s39_s0] sm:$0x3]  ;;  %s22_s0 = smov 8  }
   0x2   :  { %5 = vst [vmem:[#allocation1] sm:$0x3] %v4_v0 }
   0x9   :  { %v10_v1 = vld [vmem:[#allocation1 + $0x1] sm:$0x1]   ;;  %v6_v2 = vld [vmem:[#allocation1] sm:$0x1]  }
   0xa   :  { %11 = vrot.lane.b32.xlu0 %v10_v1, %s22_s0  ;;  %8 = vst.msk [vmem:[#allocation0] sm:$0x1] %vm7_vm0, %v6_v2  }
  0x7c   :  { %v12_v3 = vpop.permute.xlu0 %11  }
  0x7d   :  { %14 = vst.msk [vmem:[#allocation0] sm:$0x1] %vm13_vm1, %v12_v3  }
  0x84   :  { %v18_v4 = vld [vmem:[#allocation0] sm:$0x1] }
  0x85   :  { %20 = vst [vmem:[%s40_s1] sm:$0x1] %v18_v4 }

// kernel: attention_model.1
= control target key start
LH: loop header
LB: loop body
LE: loop exit
PB: predicated region body
PF: predicated region fallthrough
CT: control target
= control target key end

     0   :  { %vm35_vm0 = vcmask 261120   ;;  %s2743_s0 = inlined_call_operand.vmem [shape: f32[16,32], index: 0, kind: input, shape index: {}]   ;;  %s2744_s1 = inlined_call_operand.vmem [shape: f32[16,16], index: 1, kind: input, shape index: {}]   ;;  %s2745_s2 = inlined_call_operand.vmem [shape: f32[2,8,128], index: 2, kind: input, shape index: {}]   ;;  %s2746_s3 = inlined_call_operand.vmem [shape: bf16[2,32,96], index: 3, kind: input, shape index: {}]   ;;  %s2747_s4 = inlined_call_operand.vmem [shape: bf16[2,32,32], index: 4, kind: input, shape index: {}]   ;;  %s2748_s5 = inlined_call_operand.vmem [shape: bf16[2,32,128], index: 5, kind: input, shape index: {}]   ;;  %s2749_s6 = inlined_call_operand.vmem [shape: bf16[2,128,32], index: 6, kind: input, shape index: {}]   ;;  %s2750_s7 = inlined_call_operand.hbm [shape: f32[16,32], index: 7, kind: output, shape index: {0}]   ;;  %s2751_s8 = inlined_call_operand.vmem [shape: f32[2,2,16,16], index: 8, kind: output, shape index: {1}]  }
   0x1   :  { %v2312_v0 = vld [vmem:[%s2743_s0] sm:$0xff]  ;;  %v2317_v1 = vld [vmem:[%s2743_s0 + $0x8] sm:$0xff] }
   0x2   :  { %v36_v2 = vsel %vm35_vm0, %v2312_v0, 0.0  ;;  %v45_v3 = vmul.f32 %v2312_v0, %v2312_v0  ;;  %v39_v4 = vsel %vm35_vm0, %v2317_v1, 0.0  ;;  %v46_v5 = vmul.f32 %v2317_v1, %v2317_v1 }
   0x3   :  { %37 = vadd.xlane.f32.xlu0 %v36_v2 }
   0x4   :  { %v47_v6 = vsel %vm35_vm0, %v45_v3, 0.0  ;;  %v50_v7 = vsel %vm35_vm0, %v46_v5, 0.0 }
   0x5   :  { %48 = vadd.xlane.f32.xlu1 %v47_v6 }
   0x7   :  { %40 = vadd.xlane.f32.xlu0 %v39_v4 }
   0x9   :  { %51 = vadd.xlane.f32.xlu1 %v50_v7 }
   0xa   :  { %14 = vsyncpa [#allocation3], 0  ;;  %v2145_v8 = vld [vmem:[%s2746_s3] sm:$0xff]   ;;  %v2253_v9 = vmov 0.0   ;;  %vm2254_vm1 = vmmov 0   ;;  %v2146_v10 = vld [vmem:[%s2746_s3 + $0x8] sm:$0xff]   ;;  %v67_v23 = vlaneseq }
   0xb   :  { %1900 = vmatprep.subr.bf16.mxu1 %v2253_v9  ;;  %1904 = vmatprep.mubr.msk.bf16.mxu1 %vm2254_vm1, %v2253_v9  ;;  %v2348_v28 = vld [vmem:[%s2745_s2] sm:$0xff]  ;;  %vm150_vm2 = vcmask 130048   ;;  %s2255_s14 = smov 96   ;;  %s2256_s15 = smov 80   ;;  %v2392_v62 = vld [vmem:[%s2744_s1 + $0x8] sm:$0xff] }
   0xc   :  { %1901 = vmatpush3.bf16.msra.mxu1 %v2145_v8  ;;  %1936 = vmatprep.subr.bf16.mxu0 %v2253_v9  ;;  %v2342_v26 = vshrl.u32 %v67_v23, 7  ;;  %s2257_s16 = smov 112   ;;  %vm2375_vm3 = vmpackc.low %vm150_vm2, %vm150_vm2  ;;  %v2387_v59 = vld [vmem:[%s2744_s1] sm:$0xff]  ;;  %s2258_s1 = smov 64  }
   0xd   :  { %1902 = vmatprep.subr.bf16.mxu1 %v2253_v9  ;;  %1940 = vmatprep.mubr.msk.bf16.mxu0 %vm2254_vm1, %v2253_v9  ;;  %s2259_s25 = smov 48   ;;  %s2260_s11 = smov 16  }
   0xe   :  { %v69_v27 = vsub.s32 0, %v2342_v26  ;;  %v75_v33 = vsub.s32 1, %v2342_v26  ;;  %v86_v43 = vsub.s32 6, %v2342_v26 }
  0x10   :  { %1903 = vmatpush3.bf16.msra.mxu1 %v2146_v10  ;;  %v70_v32 = vrot.slane %v2348_v28, %v69_v27  ;;  %v76_v38 = vrot.slane %v2348_v28, %v75_v33  ;;  %v87_v44 = vrot.slane %v2348_v28, %v86_v43 }
  0x90   :  { %v38_v11 = vpop.xlane.xlu0 %37 }
  0x91   :  { %v43_v12 = vmul.f32 0.03125, %v38_v11 }
  0x92   :  { %v49_v13 = vpop.xlane.xlu1 %48 }
  0x93   :  { %v55_v14 = vmul.f32 %v43_v12, %v43_v12  ;;  %v53_v15 = vmul.f32 0.03125, %v49_v13  ;;  %v59_v29 = vsub.f32 %v2312_v0, %v43_v12 }
  0x94   :  { %v41_v16 = vpop.xlane.xlu0 %40 }
  0x95   :  { %v57_v17 = vsub.f32 %v53_v15, %v55_v14  ;;  %v44_v18 = vmul.f32 0.03125, %v41_v16 }
  0x96   :  { %v52_v19 = vpop.xlane.xlu1 %51 }
  0x97   :  { %v61_v20 = vadd.f32 1e-05, %v57_v17  ;;  %v56_v21 = vmul.f32 %v44_v18, %v44_v18  ;;  %v54_v22 = vmul.f32 0.03125, %v52_v19  ;;  %v60_v34 = vsub.f32 %v2317_v1, %v44_v18 }
  0x99   :  { %2173 = vrsqrt.f32 %v61_v20  ;;  %v58_v24 = vsub.f32 %v54_v22, %v56_v21 }
  0x9b   :  { %v62_v25 = vadd.f32 1e-05, %v58_v24 }
  0x9d   :  { %2175 = vrsqrt.f32 %v62_v25 }
  0xa3   :  { %v2174_v30 = vpop.eup %2173 }
  0xa4   :  { %v65_v31 = vmul.f32 %v2174_v30, %v59_v29 }
  0xa6   :  { %v71_v37 = vmul.f32 %v70_v32, %v65_v31 }
  0xa7   :  { %v2176_v35 = vpop.eup %2175 }
  0xa8   :  { %v66_v36 = vmul.f32 %v2176_v35, %v60_v34  ;;  %v77_v40 = vadd.f32 %v76_v38, %v71_v37 }
  0xaa   :  { %v72_v39 = vmul.f32 %v70_v32, %v66_v36 }
  0xac   :  { %v78_v41 = vadd.f32 %v76_v38, %v72_v39 }
  0xae   :  { %v79_v42 = vpack.c.bf16 %v78_v41, %v77_v40 }
  0xb0   :  { %1905 = vmatmul.mubr.msk.bf16.vlgmr.msra.gmra.mrb[0].mxu1 %vm35_vm0, %v79_v42 }
 0x183   :  { %v137_v45 = vpop.f32.mrb[0].mxu1 }
 0x184   :  { %v138_v46 = vadd.f32 %v137_v45, %v87_v44  ;;  %v1906_v47 = vpop.f32.mrb[1].mxu1 }
 0x185   :  { %v140_v48 = vpop.f32.mrb[2].mxu1 }
 0x186   :  { %v141_v49 = vadd.f32 %v140_v48, %v87_v44  ;;  %v1907_v50 = vpop.f32.mrb[3].mxu1  ;;  %1912 = vmatprep.mubr.msk.f32.mxu1 %vm150_vm2, %v138_v46 }
 0x188   :  { %v2365_v51 = vpack.i.bf16 %v141_v49, %v138_v46 }
 0x18a   :  { %2096 = vrot.lane.b32.xlu0 %v2365_v51, %s2255_s14 }
 0x18e   :  { %2106 = vrot.lane.b32.xlu0 %v2365_v51, %s2256_s15 }
 0x192   :  { %349 = vrot.lane.b32.xlu0 %v138_v46, %s2257_s16 }
 0x196   :  { %351 = vrot.lane.b32.xlu0 %v141_v49, %s2257_s16 }
 0x1fc   :  { %v2097_v52 = vpop.permute.xlu0 %2096 }
 0x1fd   :  { %v2099_v53 = vunpack.i.h.bf16 %v2097_v52  ;;  %v2098_v54 = vunpack.i.l.bf16 %v2097_v52 }
 0x1ff   :  { %v2044_v56 = vpack.c.bf16 %v2099_v53, %v2098_v54 }
 0x200   :  { %v2107_v18 = vpop.permute.xlu0 %2106 }
 0x201   :  { %2046 = vmatprep.subr.msk.bf16.mxu1 %vm2375_vm3, %v2044_v56  ;;  %v2109_v20 = vunpack.i.h.bf16 %v2107_v18  ;;  %v2108_v21 = vunpack.i.l.bf16 %v2107_v18 }
 0x202   :  { %2049 = vmatpush3.bf16.xpose.msk.msra.mxu1 %vm2375_vm3, %v2044_v56 }
 0x203   :  { %v2054_v30 = vpack.c.bf16 %v2109_v20, %v2108_v21  ;;  %v631_v20 = vsub.s32 4, %v2342_v26 }
 0x204   :  { %v350_v34 = vpop.permute.xlu0 %349 }
 0x205   :  { %v632_v21 = vrot.slane %v2348_v28, %v631_v20 }
 0x208   :  { %v352_v35 = vpop.permute.xlu0 %351 }
 0x209   :  { %1913 = vmatmul.mubr.msk.f32.vlgmr.msra.gmra.mrb[4].mxu1 %vm150_vm2, %v141_v49 }
 0x2dc   :  { %v1914_v57 = vpop.f32.mrb[4].mxu1 }
 0x2dd   :  { %v225_v58 = vpop.f32.mrb[5].mxu1  ;;  %v235_v60 = vmul.f32 0.25, %v1914_v57 }
 0x2de   :  { %v234_v61 = vmul.f32 0.25, %v225_v58 }
 0x2df   :  { %v237_v3 = vadd.f32 %v235_v60, %v2392_v62 }
 0x2e0   :  { %v236_v63 = vadd.f32 %v234_v61, %v2387_v59 }
 0x2e1   :  { %v241_v4 = vsel %vm150_vm2, %v237_v3, -inf }
 0x2e2   :  { %v238_v2 = vsel %vm150_vm2, %v236_v63, -inf }
 0x2e3   :  { %239 = vmax.xlane.f32.xlu1 %v238_v2 }
 0x2e7   :  { %242 = vmax.xlane.f32.xlu1 %v241_v4 }
 0x370   :  { %v240_v5 = vpop.xlane.xlu1 %239 }
 0x371   :  { %v244_v6 = vsub.f32 %v236_v63, %v240_v5 }
 0x373   :  { %v246_v10 = vmul.f32 1.442695, %v244_v6 }
 0x374   :  { %v243_v7 = vpop.xlane.xlu1 %242 }
 0x375   :  { %v245_v8 = vsub.f32 %v237_v3, %v243_v7 }
 0x377   :  { %v248_v11 = vmul.f32 1.442695, %v245_v8  ;;  %v2147_v8 = vld [vmem:[%s2747_s4] sm:$0xff]  }
 0x378   :  { %1937 = vmatpush3.bf16.msra.mxu0 %v2147_v8 }
 0x379   :  { %2177 = vpow2.f32 %v248_v11  ;;  %1938 = vmatprep.subr.bf16.mxu0 %v2253_v9 }
 0x37a   :  { %2179 = vpow2.f32 %v246_v10  ;;  %v2148_v10 = vld [vmem:[%s2747_s4 + $0x8] sm:$0xff]  }
 0x37c   :  { %1939 = vmatpush3.bf16.msra.mxu0 %v2148_v10 }
 0x37d   :  { %1952 = vmatprep.subr.bf16.mxu0 %v2253_v9 }
 0x383   :  { %v2178_v12 = vpop.eup %2177 }
 0x384   :  { %v253_v13 = vsel %vm150_vm2, %v2178_v12, 0.0  ;;  %v2180_v14 = vpop.eup %2179 }
 0x385   :  { %254 = vadd.xlane.f32.xlu1 %v253_v13  ;;  %v250_v15 = vsel %vm150_vm2, %v2180_v14, 0.0 }
 0x389   :  { %251 = vadd.xlane.f32.xlu1 %v250_v15 }
 0x39a   :  { %2101 = vrot.lane.b32.xlu1 %v2365_v51, %s2258_s1 }
 0x412   :  { %v255_v16 = vpop.xlane.xlu1 %254 }
 0x413   :  { %2181 = vrcp.f32 %v255_v16 }
 0x416   :  { %v252_v17 = vpop.xlane.xlu1 %251 }
 0x417   :  { %2183 = vrcp.f32 %v252_v17 }
 0x41a   :  { %v2102_v19 = vpop.permute.xlu1 %2101 }
 0x41b   :  { %v2104_v22 = vunpack.i.h.bf16 %v2102_v19  ;;  %v2103_v23 = vunpack.i.l.bf16 %v2102_v19 }
 0x41d   :  { %v2182_v24 = vpop.eup %2181  ;;  %v2050_v25 = vpack.c.bf16 %v2104_v22, %v2103_v23 }
 0x41e   :  { %v259_v29 = vmul.f32 %v2182_v24, %v2178_v12 }
 0x41f   :  { %2051 = vmatprep.subr.bf16.mxu1 %v2050_v25 }
 0x420   :  { %261 = vst.msk [vmem:[%s2751_s8 + $0x8] sm:$0xff] %vm150_vm2, %v259_v29  ;;  %2053 = vmatpush3.bf16.msra.mxu1 %v2050_v25 }
 0x421   :  { %v2184_v31 = vpop.eup %2183  ;;  %2056 = vmatprep.subr.msk.bf16.mxu1 %vm2375_vm3, %v2054_v30 }
 0x422   :  { %v257_v32 = vmul.f32 %v2184_v31, %v2180_v14 }
 0x424   :  { %260 = vst.msk [vmem:[%s2751_s8] sm:$0xff] %vm150_vm2, %v257_v32  ;;  %1919 = vmatprep.mubr.msk.f32.mxu1 %vm150_vm2, %v257_v32 }
 0x425   :  { %1920 = vmatmul.mubr.msk.f32.vlgmr.msra.gmra.mrb[6].mxu1 %vm150_vm2, %v259_v29 }
 0x426   :  { %1926 = vmatprep.mubr.msk.f32.mxu1 %vm150_vm2, %v350_v34 }
 0x429   :  { %2059 = vmatpush3.bf16.xpose.msk.msra.mxu1 %vm2375_vm3, %v2054_v30 }
 0x430   :  { %1927 = vmatmul.mubr.msk.f32.vlgmr.msra.gmra.mrb[8].mxu1 %vm150_vm2, %v352_v35 }
 0x4f8   :  { %v2418_v36 = vpop.f32.mrb[6].mxu1 }
 0x4f9   :  { %v2420_v37 = vpop.f32.mrb[7].mxu1 }
 0x503   :  { %v1928_v38 = vpop.f32.mrb[8].mxu1 }
 0x504   :  { %v441_v39 = vmul.f32 0.25, %v1928_v38  ;;  %v431_v40 = vpop.f32.mrb[9].mxu1  ;;  %v2149_v38 = vld [vmem:[%s2748_s5] sm:$0xff]  }
 0x505   :  { %v440_v41 = vmul.f32 0.25, %v431_v40 }
 0x506   :  { %v443_v42 = vadd.f32 %v441_v39, %v2392_v62  ;;  %v2150_v39 = vld [vmem:[%s2748_s5 + $0x8] sm:$0xff]  }
 0x507   :  { %v442_v44 = vadd.f32 %v440_v41, %v2387_v59 }
 0x508   :  { %v447_v45 = vsel %vm150_vm2, %v443_v42, -inf }
 0x509   :  { %448 = vmax.xlane.f32.xlu0 %v447_v45  ;;  %v444_v46 = vsel %vm150_vm2, %v442_v44, -inf }
 0x50a   :  { %445 = vmax.xlane.f32.xlu1 %v444_v46 }
 0x51b   :  { %2111 = vrot.lane.b32.xlu1 %v2365_v51, %s2259_s25 }
 0x596   :  { %v449_v47 = vpop.xlane.xlu0 %448 }
 0x597   :  { %v451_v48 = vsub.f32 %v443_v42, %v449_v47  ;;  %v446_v49 = vpop.xlane.xlu1 %445 }
 0x598   :  { %v450_v50 = vsub.f32 %v442_v44, %v446_v49 }
 0x599   :  { %v454_v52 = vmul.f32 1.442695, %v451_v48 }
 0x59a   :  { %v452_v53 = vmul.f32 1.442695, %v450_v50 }
 0x59b   :  { %v2112_v54 = vpop.permute.xlu1 %2111 }
 0x59c   :  { %2185 = vpow2.f32 %v452_v53  ;;  %v2114_v56 = vunpack.i.h.bf16 %v2112_v54  ;;  %v2113_v57 = vunpack.i.l.bf16 %v2112_v54 }
 0x59d   :  { %2187 = vpow2.f32 %v454_v52 }
 0x59e   :  { %v2060_v58 = vpack.c.bf16 %v2114_v56, %v2113_v57  ;;  %v667_v57 = vsub.s32 2, %v2342_v26 }
 0x5a0   :  { %2061 = vmatprep.subr.bf16.mxu1 %v2060_v58 }
 0x5a1   :  { %2063 = vmatpush3.bf16.msra.mxu1 %v2060_v58 }
 0x5a2   :  { %1944 = vmatprep.subr.bf16.mxu1 %v2253_v9 }
 0x5a6   :  { %v2186_v60 = vpop.eup %2185 }
 0x5a7   :  { %v456_v61 = vsel %vm150_vm2, %v2186_v60, 0.0  ;;  %v2188_v51 = vpop.eup %2187 }
 0x5a8   :  { %457 = vadd.xlane.f32.xlu0 %v456_v61  ;;  %v459_v63 = vsel %vm150_vm2, %v2188_v51, 0.0  ;;  %v673_v61 = vsub.s32 3, %v2342_v26 }
 0x5ac   :  { %460 = vadd.xlane.f32.xlu0 %v459_v63 }
 0x635   :  { %v458_v2 = vpop.xlane.xlu0 %457 }
 0x636   :  { %2189 = vrcp.f32 %v458_v2 }
 0x639   :  { %v461_v3 = vpop.xlane.xlu0 %460 }
 0x63a   :  { %2191 = vrcp.f32 %v461_v3 }
 0x640   :  { %v2190_v4 = vpop.eup %2189 }
 0x641   :  { %v463_v5 = vmul.f32 %v2190_v4, %v2186_v60  ;;  %v668_v60 = vrot.slane %v2348_v28, %v667_v57 }
 0x643   :  { %1752 = vst.msk [vmem:[%s2751_s8 + $0x10] sm:$0xff] %vm150_vm2, %v463_v5  ;;  %1933 = vmatprep.mubr.msk.f32.mxu1 %vm150_vm2, %v463_v5 }
 0x644   :  { %v2192_v6 = vpop.eup %2191 }
 0x645   :  { %v465_v7 = vmul.f32 %v2192_v6, %v2188_v51  ;;  %v674_v6 = vrot.slane %v2348_v28, %v673_v61 }
 0x647   :  { %1753 = vst.msk [vmem:[%s2751_s8 + $0x18] sm:$0xff] %vm150_vm2, %v465_v7  ;;  %1934 = vmatmul.mubr.msk.f32.vlgmr.msra.gmra.mrb[10].mxu1 %vm150_vm2, %v465_v7 }
 0x648   :  { %1948 = vmatprep.mubr.msk.bf16.mxu1 %vm2254_vm1, %v2253_v9  ;;  %1945 = vmatpush3.bf16.msra.mxu1 %v2149_v38 }
 0x649   :  { %1946 = vmatprep.subr.bf16.mxu1 %v2253_v9 }
 0x64c   :  { %1947 = vmatpush3.bf16.msra.mxu1 %v2150_v39 }
 0x64d   :  { %1972 = vmatprep.subr.bf16.mxu1 %v2253_v9 }
 0x71a   :  { %v1935_v11 = vpop.f32.mrb[10].mxu1 }
 0x71b   :  { %v547_v12 = vpop.f32.mrb[11].mxu1 }
 0x71c   :  { %v2115_v13 = vpack.i.bf16 %v1935_v11, %v547_v12  ;;  %v2151_v12 = vld [vmem:[%s2749_s6] sm:$0xff]  }
 0x71e   :  { %2116 = vrot.lane.b32.xlu0 %v2115_v13, %s2260_s11  ;;  %v2152_v13 = vld [vmem:[%s2749_s6 + $0x8] sm:$0xff]  }
 0x790   :  { %v2117_v14 = vpop.permute.xlu0 %2116 }
 0x791   :  { %v2119_v15 = vunpack.i.h.bf16 %v2117_v14  ;;  %v2118_v16 = vunpack.i.l.bf16 %v2117_v14  ;;  %v2153_v14 = vld [vmem:[%s2749_s6 + $0x10] sm:$0xff]  }
 0x793   :  { %v565_v17 = vsel %vm150_vm2, %v2418_v36, %v2119_v15  ;;  %v564_v18 = vsel %vm150_vm2, %v2420_v37, %v2118_v16  ;;  %v2154_v15 = vld [vmem:[%s2749_s6 + $0x18] sm:$0xff]   ;;  %v2155_v16 = vld [vmem:[%s2749_s6 + $0x20] sm:$0xff]  }
 0x794   :  { %v566_v19 = vpack.c.bf16 %v565_v17, %v564_v18  ;;  %v2156_v17 = vld [vmem:[%s2749_s6 + $0x28] sm:$0xff]   ;;  %v2157_v18 = vld [vmem:[%s2749_s6 + $0x30] sm:$0xff]  }
 0x796   :  { %1941 = vmatmul.mubr.msk.bf16.vlgmr.msra.gmra.mrb[0].mxu0 %vm35_vm0, %v566_v19  ;;  %v2158_v19 = vld [vmem:[%s2749_s6 + $0x38] sm:$0xff]  }
 0x797   :  { %1968 = vmatprep.mubr.msk.bf16.mxu0 %vm2254_vm1, %v2253_v9  ;;  %1953 = vmatpush3.bf16.msra.mxu0 %v2151_v12 }
 0x798   :  { %1954 = vmatprep.subr.bf16.mxu0 %v2253_v9 }
 0x79b   :  { %1955 = vmatpush3.bf16.msra.mxu0 %v2152_v13 }
 0x79c   :  { %1956 = vmatprep.subr.bf16.mxu0 %v2253_v9 }
 0x79f   :  { %1957 = vmatpush3.bf16.msra.mxu0 %v2153_v14 }
 0x7a0   :  { %1958 = vmatprep.subr.bf16.mxu0 %v2253_v9 }
 0x7a3   :  { %1959 = vmatpush3.bf16.msra.mxu0 %v2154_v15 }
 0x7a4   :  { %1960 = vmatprep.subr.bf16.mxu0 %v2253_v9 }
 0x7a7   :  { %1961 = vmatpush3.bf16.msra.mxu0 %v2155_v16 }
 0x7a8   :  { %1962 = vmatprep.subr.bf16.mxu0 %v2253_v9 }
 0x7ab   :  { %1963 = vmatpush3.bf16.msra.mxu0 %v2156_v17 }
 0x7ac   :  { %1964 = vmatprep.subr.bf16.mxu0 %v2253_v9 }
 0x7af   :  { %1965 = vmatpush3.bf16.msra.mxu0 %v2157_v18 }
 0x7b0   :  { %1966 = vmatprep.subr.bf16.mxu0 %v2253_v9 }
 0x7b3   :  { %1967 = vmatpush3.bf16.msra.mxu0 %v2158_v19 }
 0x7b4   :  { %2008 = vmatprep.subr.bf16.mxu0 %v2253_v9 }
 0x869   :  { %v620_v22 = vpop.f32.mrb[0].mxu0 }
 0x86a   :  { %v627_v23 = vadd.f32 %v620_v22, %v2312_v0  ;;  %v1942_v24 = vpop.f32.mrb[1].mxu0 }
 0x86b   :  { %v623_v25 = vpop.f32.mrb[2].mxu0 }
 0x86c   :  { %v2464_v29 = vadd.f32 %v632_v21, %v627_v23  ;;  %v628_v30 = vadd.f32 %v623_v25, %v2317_v1  ;;  %v1943_v31 = vpop.f32.mrb[3].mxu0 }
 0x86e   :  { %v2467_v32 = vadd.f32 %v632_v21, %v628_v30  ;;  %v635_v34 = vsel %vm35_vm0, %v2464_v29, 0.0  ;;  %v643_v35 = vmul.f32 %v2464_v29, %v2464_v29  ;;  %v684_v21 = vsub.s32 7, %v2342_v26 }
 0x86f   :  { %636 = vadd.xlane.f32.xlu1 %v635_v34 }
 0x870   :  { %v638_v36 = vsel %vm35_vm0, %v2467_v32, 0.0  ;;  %v644_v0 = vmul.f32 %v2467_v32, %v2467_v32  ;;  %v645_v37 = vsel %vm35_vm0, %v643_v35, 0.0  ;;  %v685_v22 = vrot.slane %v2348_v28, %v684_v21 }
 0x871   :  { %639 = vadd.xlane.f32.xlu0 %v638_v36 }
 0x872   :  { %v648_v1 = vsel %vm35_vm0, %v644_v0, 0.0 }
 0x873   :  { %646 = vadd.xlane.f32.xlu1 %v645_v37 }
 0x875   :  { %649 = vadd.xlane.f32.xlu0 %v648_v1 }
 0x8fc   :  { %v637_v40 = vpop.xlane.xlu1 %636 }
 0x8fd   :  { %v641_v41 = vmul.f32 0.03125, %v637_v40 }
 0x8fe   :  { %v640_v42 = vpop.xlane.xlu0 %639 }
 0x8ff   :  { %v642_v44 = vmul.f32 0.03125, %v640_v42  ;;  %v653_v46 = vmul.f32 %v641_v41, %v641_v41  ;;  %v657_v58 = vsub.f32 %v2464_v29, %v641_v41 }
 0x900   :  { %v647_v45 = vpop.xlane.xlu1 %646 }
 0x901   :  { %v651_v47 = vmul.f32 0.03125, %v647_v45  ;;  %v654_v49 = vmul.f32 %v642_v44, %v642_v44  ;;  %v658_v63 = vsub.f32 %v2467_v32, %v642_v44 }
 0x902   :  { %v650_v48 = vpop.xlane.xlu0 %649 }
 0x903   :  { %v655_v50 = vsub.f32 %v651_v47, %v653_v46  ;;  %v652_v52 = vmul.f32 0.03125, %v650_v48 }
 0x905   :  { %v659_v53 = vadd.f32 1e-05, %v655_v50  ;;  %v656_v54 = vsub.f32 %v652_v52, %v654_v49 }
 0x907   :  { %2193 = vrsqrt.f32 %v659_v53  ;;  %v660_v56 = vadd.f32 1e-05, %v656_v54  ;;  %v870_v54 = vsub.s32 5, %v2342_v26 }
 0x909   :  { %2195 = vrsqrt.f32 %v660_v56  ;;  %v871_v56 = vrot.slane %v2348_v28, %v870_v54 }
 0x911   :  { %v2194_v51 = vpop.eup %2193 }
 0x912   :  { %v663_v2 = vmul.f32 %v2194_v51, %v657_v58 }
 0x913   :  { %v2196_v3 = vpop.eup %2195 }
 0x914   :  { %v664_v4 = vmul.f32 %v2196_v3, %v658_v63  ;;  %v669_v5 = vmul.f32 %v668_v60, %v663_v2 }
 0x916   :  { %v670_v7 = vmul.f32 %v668_v60, %v664_v4  ;;  %v675_v8 = vadd.f32 %v674_v6, %v669_v5 }
 0x918   :  { %v676_v10 = vadd.f32 %v674_v6, %v670_v7 }
 0x91a   :  { %v677_v11 = vpack.c.bf16 %v676_v10, %v675_v8  ;;  %v2159_v10 = vld [vmem:[%s2746_s3 + $0x10] sm:$0xff]  }
 0x91c   :  { %1949 = vmatmul.mubr.msk.bf16.vlgmr.msra.gmra.mrb[12].mxu1 %vm35_vm0, %v677_v11  ;;  %v2160_v11 = vld [vmem:[%s2746_s3 + $0x18] sm:$0xff]  }
 0x91d   :  { %1976 = vmatprep.mubr.msk.bf16.mxu1 %vm2254_vm1, %v2253_v9  ;;  %1973 = vmatpush3.bf16.msra.mxu1 %v2159_v10 }
 0x91e   :  { %1974 = vmatprep.subr.bf16.mxu1 %v2253_v9 }
 0x921   :  { %1975 = vmatpush3.bf16.msra.mxu1 %v2160_v11 }
 0x9ef   :  { %v735_v23 = vpop.f32.mrb[12].mxu1 }
 0x9f0   :  { %v736_v24 = vadd.f32 %v735_v23, %v685_v22  ;;  %v1950_v25 = vpop.f32.mrb[13].mxu1 }
 0x9f1   :  { %v738_v30 = vpop.f32.mrb[14].mxu1 }
 0x9f2   :  { %v742_v31 = vmul.f32 %v736_v24, %v736_v24  ;;  %v739_v34 = vadd.f32 %v738_v30, %v685_v22  ;;  %v1951_v35 = vpop.f32.mrb[15].mxu1 }
 0x9f4   :  { %v744_v36 = vmul.f32 %v742_v31, %v736_v24  ;;  %v743_v0 = vmul.f32 %v739_v34, %v739_v34 }
 0x9f6   :  { %v746_v37 = vmul.f32 0.044715, %v744_v36  ;;  %v745_v1 = vmul.f32 %v743_v0, %v739_v34 }
 0x9f8   :  { %v748_v38 = vadd.f32 %v746_v37, %v736_v24  ;;  %v747_v39 = vmul.f32 0.044715, %v745_v1 }
 0x9fa   :  { %v750_v40 = vmul.f32 0.7978846, %v748_v38  ;;  %v749_v41 = vadd.f32 %v747_v39, %v739_v34 }
 0x9fc   :  { %2197 = vtanh.f32 %v750_v40  ;;  %v751_v42 = vmul.f32 0.7978846, %v749_v41 }
 0x9fe   :  { %2199 = vtanh.f32 %v751_v42 }
 0xa06   :  { %v2198_v44 = vpop.eup %2197 }
 0xa07   :  { %v754_v45 = vadd.f32 1.0, %v2198_v44 }
 0xa08   :  { %v2200_v46 = vpop.eup %2199 }
 0xa09   :  { %v756_v47 = vmul.f32 0.5, %v754_v45  ;;  %v755_v48 = vadd.f32 1.0, %v2200_v46 }
 0xa0b   :  { %v757_v49 = vmul.f32 0.5, %v755_v48  ;;  %v758_v50 = vmul.f32 %v756_v47, %v736_v24 }
 0xa0d   :  { %v759_v52 = vmul.f32 %v757_v49, %v739_v34  ;;  %v2568_v34 = vld [vmem:[%s2745_s2 + $0x8] sm:$0xff] }
 0xa0e   :  { %v909_v35 = vrot.slane %v2568_v34, %v69_v27  ;;  %v915_v37 = vrot.slane %v2568_v34, %v75_v33  ;;  %v927_v27 = vrot.slane %v2568_v34, %v86_v43 }
 0xa0f   :  { %v760_v53 = vpack.c.bf16 %v759_v52, %v758_v50 }
 0xa11   :  { %1969 = vmatmul.mubr.bf16.vlgmr.msra.gmra.mrb[4].mxu0 %v760_v53 }
 0xa12   :  { %2012 = vmatprep.mubr.msk.bf16.mxu0 %vm2254_vm1, %v2253_v9 }
 0xae4   :  { %v859_v58 = vpop.f32.mrb[4].mxu0 }
 0xae5   :  { %v866_v60 = vadd.f32 %v859_v58, %v2464_v29  ;;  %v1970_v51 = vpop.f32.mrb[5].mxu0 }
 0xae6   :  { %v862_v63 = vpop.f32.mrb[6].mxu0 }
 0xae7   :  { %v2543_v2 = vadd.f32 %v871_v56, %v866_v60  ;;  %v867_v3 = vadd.f32 %v862_v63, %v2467_v32  ;;  %v1971_v4 = vpop.f32.mrb[7].mxu0 }
 0xae9   :  { %v2546_v5 = vadd.f32 %v871_v56, %v867_v3  ;;  %v876_v6 = vsel %vm35_vm0, %v2543_v2, 0.0  ;;  %v884_v7 = vmul.f32 %v2543_v2, %v2543_v2 }
 0xaea   :  { %877 = vadd.xlane.f32.xlu1 %v876_v6 }
 0xaeb   :  { %v879_v28 = vsel %vm35_vm0, %v2546_v5, 0.0  ;;  %v885_v29 = vmul.f32 %v2546_v5, %v2546_v5  ;;  %v886_v8 = vsel %vm35_vm0, %v884_v7, 0.0 }
 0xaec   :  { %880 = vadd.xlane.f32.xlu0 %v879_v28 }
 0xaed   :  { %v889_v32 = vsel %vm35_vm0, %v885_v29, 0.0 }
 0xaee   :  { %887 = vadd.xlane.f32.xlu1 %v886_v8 }
 0xaf0   :  { %890 = vadd.xlane.f32.xlu0 %v889_v32 }
 0xb77   :  { %v878_v12 = vpop.xlane.xlu1 %877 }
 0xb78   :  { %v882_v13 = vmul.f32 0.03125, %v878_v12 }
 0xb79   :  { %v881_v14 = vpop.xlane.xlu0 %880 }
 0xb7a   :  { %v883_v15 = vmul.f32 0.03125, %v881_v14  ;;  %v894_v17 = vmul.f32 %v882_v13, %v882_v13  ;;  %v898_v36 = vsub.f32 %v2543_v2, %v882_v13 }
 0xb7b   :  { %v888_v16 = vpop.xlane.xlu1 %887 }
 0xb7c   :  { %v892_v18 = vmul.f32 0.03125, %v888_v16  ;;  %v895_v22 = vmul.f32 %v883_v15, %v883_v15  ;;  %v899_v1 = vsub.f32 %v2546_v5, %v883_v15 }
 0xb7d   :  { %v891_v19 = vpop.xlane.xlu0 %890 }
 0xb7e   :  { %v896_v23 = vsub.f32 %v892_v18, %v894_v17  ;;  %v893_v24 = vmul.f32 0.03125, %v891_v19 }
 0xb80   :  { %v900_v25 = vadd.f32 1e-05, %v896_v23  ;;  %v897_v30 = vsub.f32 %v893_v24, %v895_v22 }
 0xb82   :  { %2201 = vrsqrt.f32 %v900_v25  ;;  %v901_v31 = vadd.f32 1e-05, %v897_v30 }
 0xb84   :  { %2203 = vrsqrt.f32 %v901_v31 }
 0xb8c   :  { %v2202_v0 = vpop.eup %2201 }
 0xb8d   :  { %v904_v38 = vmul.f32 %v2202_v0, %v898_v36 }
 0xb8e   :  { %v2204_v39 = vpop.eup %2203 }
 0xb8f   :  { %v905_v40 = vmul.f32 %v2204_v39, %v899_v1  ;;  %v910_v41 = vmul.f32 %v909_v35, %v904_v38 }
 0xb91   :  { %v911_v42 = vmul.f32 %v909_v35, %v905_v40  ;;  %v916_v44 = vadd.f32 %v915_v37, %v910_v41 }
 0xb93   :  { %v917_v45 = vadd.f32 %v915_v37, %v911_v42 }
 0xb95   :  { %v918_v46 = vpack.c.bf16 %v917_v45, %v916_v44 }
 0xb97   :  { %1977 = vmatmul.mubr.msk.bf16.vlgmr.msra.gmra.mrb[16].mxu1 %vm35_vm0, %v918_v46 }
 0xc6a   :  { %v977_v47 = vpop.f32.mrb[16].mxu1 }
 0xc6b   :  { %v978_v48 = vadd.f32 %v977_v47, %v927_v27  ;;  %v1978_v49 = vpop.f32.mrb[17].mxu1 }
 0xc6c   :  { %v980_v33 = vpop.f32.mrb[18].mxu1 }
 0xc6d   :  { %v981_v50 = vadd.f32 %v980_v33, %v927_v27  ;;  %v1979_v52 = vpop.f32.mrb[19].mxu1  ;;  %1984 = vmatprep.mubr.msk.f32.mxu1 %vm150_vm2, %v978_v48 }
 0xc6f   :  { %v2583_v53 = vpack.i.bf16 %v981_v50, %v978_v48 }
 0xc71   :  { %2121 = vrot.lane.b32.xlu1 %v2583_v53, %s2255_s14 }
 0xc75   :  { %2126 = vrot.lane.b32.xlu1 %v2583_v53, %s2258_s1 }
 0xc79   :  { %1189 = vrot.lane.b32.xlu1 %v978_v48, %s2257_s16 }
 0xc7d   :  { %1191 = vrot.lane.b32.xlu1 %v981_v50, %s2257_s16 }
 0xce3   :  { %v2122_v43 = vpop.permute.xlu1 %2121 }
 0xce4   :  { %v2124_v56 = vunpack.i.h.bf16 %v2122_v43  ;;  %v2123_v58 = vunpack.i.l.bf16 %v2122_v43 }
 0xce6   :  { %v2064_v60 = vpack.c.bf16 %v2124_v56, %v2123_v58 }
 0xce7   :  { %v2127_v51 = vpop.permute.xlu1 %2126 }
 0xce8   :  { %v2129_v63 = vunpack.i.h.bf16 %v2127_v51  ;;  %v2128_v3 = vunpack.i.l.bf16 %v2127_v51  ;;  %2066 = vmatprep.subr.msk.bf16.mxu1 %vm2375_vm3, %v2064_v60 }
 0xce9   :  { %2069 = vmatpush3.bf16.xpose.msk.msra.mxu1 %vm2375_vm3, %v2064_v60 }
 0xcea   :  { %v2070_v4 = vpack.c.bf16 %v2129_v63, %v2128_v3 }
 0xceb   :  { %v1190_v39 = vpop.permute.xlu1 %1189 }
 0xcec   :  { %2071 = vmatprep.subr.bf16.mxu1 %v2070_v4 }
 0xcef   :  { %v1192_v40 = vpop.permute.xlu1 %1191 }
 0xcf0   :  { %1985 = vmatmul.mubr.msk.f32.vlgmr.msra.gmra.mrb[20].mxu1 %vm150_vm2, %v981_v50 }
 0xcf1   :  { %2073 = vmatpush3.bf16.msra.mxu1 %v2070_v4 }
 0xdc3   :  { %v1986_v6 = vpop.f32.mrb[20].mxu1 }
 0xdc4   :  { %v1064_v7 = vpop.f32.mrb[21].mxu1  ;;  %v1074_v28 = vmul.f32 0.25, %v1986_v6 }
 0xdc5   :  { %v1073_v29 = vmul.f32 0.25, %v1064_v7 }
 0xdc6   :  { %v1076_v10 = vadd.f32 %v1074_v28, %v2392_v62 }
 0xdc7   :  { %v1075_v8 = vadd.f32 %v1073_v29, %v2387_v59 }
 0xdc8   :  { %v1080_v11 = vsel %vm150_vm2, %v1076_v10, -inf }
 0xdc9   :  { %v1077_v32 = vsel %vm150_vm2, %v1075_v8, -inf }
 0xdca   :  { %1078 = vmax.xlane.f32.xlu0 %v1077_v32 }
 0xdce   :  { %1081 = vmax.xlane.f32.xlu0 %v1080_v11  ;;  %v2162_v11 = vld [vmem:[%s2747_s4 + $0x18] sm:$0xff]  }
 0xe57   :  { %v1079_v12 = vpop.xlane.xlu0 %1078 }
 0xe58   :  { %v1083_v13 = vsub.f32 %v1075_v8, %v1079_v12 }
 0xe5a   :  { %v1085_v16 = vmul.f32 1.442695, %v1083_v13 }
 0xe5b   :  { %v1082_v14 = vpop.xlane.xlu0 %1081 }
 0xe5c   :  { %v1084_v15 = vsub.f32 %v1076_v10, %v1082_v14  ;;  %v2161_v10 = vld [vmem:[%s2747_s4 + $0x10] sm:$0xff]  }
 0xe5d   :  { %2009 = vmatpush3.bf16.msra.mxu0 %v2161_v10  ;;  %v2169_v10 = vld [vmem:[%s2749_s6 + $0x60] sm:$0xff]  }
 0xe5e   :  { %v1087_v17 = vmul.f32 1.442695, %v1084_v15  ;;  %2010 = vmatprep.subr.bf16.mxu0 %v2253_v9 }
 0xe60   :  { %2205 = vpow2.f32 %v1087_v17 }
 0xe61   :  { %2207 = vpow2.f32 %v1085_v16  ;;  %2011 = vmatpush3.bf16.msra.mxu0 %v2162_v11  ;;  %v2170_v11 = vld [vmem:[%s2749_s6 + $0x68] sm:$0xff]  }
 0xe62   :  { %2024 = vmatprep.subr.bf16.mxu0 %v2253_v9 }
 0xe6a   :  { %v2206_v18 = vpop.eup %2205 }
 0xe6b   :  { %v1092_v19 = vsel %vm150_vm2, %v2206_v18, 0.0  ;;  %v2208_v22 = vpop.eup %2207 }
 0xe6c   :  { %1093 = vadd.xlane.f32.xlu0 %v1092_v19  ;;  %v1089_v23 = vsel %vm150_vm2, %v2208_v22, 0.0 }
 0xe70   :  { %1090 = vadd.xlane.f32.xlu0 %v1089_v23  ;;  %v1473_v23 = vrot.slane %v2568_v34, %v631_v20 }
 0xe86   :  { %2131 = vrot.lane.b32.xlu0 %v2583_v53, %s2256_s15 }
 0xef9   :  { %v1094_v24 = vpop.xlane.xlu0 %1093 }
 0xefa   :  { %2209 = vrcp.f32 %v1094_v24 }
 0xefd   :  { %v1091_v25 = vpop.xlane.xlu0 %1090 }
 0xefe   :  { %2211 = vrcp.f32 %v1091_v25 }
 0xf01   :  { %v2132_v30 = vpop.permute.xlu0 %2131 }
 0xf02   :  { %v2134_v31 = vunpack.i.h.bf16 %v2132_v30  ;;  %v2133_v35 = vunpack.i.l.bf16 %v2132_v30 }
 0xf04   :  { %v2210_v36 = vpop.eup %2209  ;;  %v2074_v0 = vpack.c.bf16 %v2134_v31, %v2133_v35 }
 0xf05   :  { %v1098_v37 = vmul.f32 %v2210_v36, %v2206_v18 }
 0xf06   :  { %2076 = vmatprep.subr.msk.bf16.mxu1 %vm2375_vm3, %v2074_v0 }
 0xf07   :  { %1783 = vst.msk [vmem:[%s2751_s8 + $0x28] sm:$0xff] %vm150_vm2, %v1098_v37 }
 0xf08   :  { %v2212_v1 = vpop.eup %2211 }
 0xf09   :  { %v1096_v38 = vmul.f32 %v2212_v1, %v2208_v22 }
 0xf0b   :  { %1782 = vst.msk [vmem:[%s2751_s8 + $0x20] sm:$0xff] %vm150_vm2, %v1096_v38  ;;  %1991 = vmatprep.mubr.msk.f32.mxu1 %vm150_vm2, %v1096_v38 }
 0xf0c   :  { %1992 = vmatmul.mubr.msk.f32.vlgmr.msra.gmra.mrb[22].mxu1 %vm150_vm2, %v1098_v37 }
 0xf0d   :  { %2079 = vmatpush3.bf16.xpose.msk.msra.mxu1 %vm2375_vm3, %v2074_v0  ;;  %1998 = vmatprep.mubr.msk.f32.mxu1 %vm150_vm2, %v1190_v39 }
 0xf14   :  { %1999 = vmatmul.mubr.msk.f32.vlgmr.msra.gmra.mrb[24].mxu1 %vm150_vm2, %v1192_v40  ;;  %v2163_v40 = vld [vmem:[%s2748_s5 + $0x10] sm:$0xff]  }
 0xfdf   :  { %v1993_v41 = vpop.f32.mrb[22].mxu1 }
 0xfe0   :  { %v1180_v42 = vpop.f32.mrb[23].mxu1 }
 0xfe7   :  { %v2000_v44 = vpop.f32.mrb[24].mxu1 }
 0xfe8   :  { %v1281_v45 = vmul.f32 0.25, %v2000_v44  ;;  %v1271_v46 = vpop.f32.mrb[25].mxu1 }
 0xfe9   :  { %v1280_v27 = vmul.f32 0.25, %v1271_v46 }
 0xfea   :  { %v1283_v47 = vadd.f32 %v1281_v45, %v2392_v62 }
 0xfeb   :  { %v1282_v48 = vadd.f32 %v1280_v27, %v2387_v59 }
 0xfec   :  { %v1287_v49 = vsel %vm150_vm2, %v1283_v47, -inf }
 0xfed   :  { %1288 = vmax.xlane.f32.xlu0 %v1287_v49  ;;  %v1284_v55 = vsel %vm150_vm2, %v1282_v48, -inf }
 0xfee   :  { %1285 = vmax.xlane.f32.xlu1 %v1284_v55 }
0x1003   :  { %2136 = vrot.lane.b32.xlu0 %v2583_v53, %s2259_s25 }
0x107a   :  { %v1289_v33 = vpop.xlane.xlu0 %1288 }
0x107b   :  { %v1291_v50 = vsub.f32 %v1283_v47, %v1289_v33  ;;  %v1286_v52 = vpop.xlane.xlu1 %1285 }
0x107c   :  { %v1290_v43 = vsub.f32 %v1282_v48, %v1286_v52 }
0x107d   :  { %v1294_v56 = vmul.f32 1.442695, %v1291_v50 }
0x107e   :  { %v1292_v58 = vmul.f32 1.442695, %v1290_v43  ;;  %v2137_v60 = vpop.permute.xlu0 %2136 }
0x107f   :  { %v2139_v51 = vunpack.i.h.bf16 %v2137_v60  ;;  %v2138_v62 = vunpack.i.l.bf16 %v2137_v60  ;;  %v1509_v60 = vrot.slane %v2568_v34, %v667_v57  ;;  %v2165_v57 = vld [vmem:[%s2749_s6 + $0x40] sm:$0xff]  }
0x1080   :  { %2213 = vpow2.f32 %v1292_v58 }
0x1081   :  { %v2080_v59 = vpack.c.bf16 %v2139_v51, %v2138_v62  ;;  %2215 = vpow2.f32 %v1294_v56 }
0x1083   :  { %2081 = vmatprep.subr.bf16.mxu1 %v2080_v59 }
0x1084   :  { %2083 = vmatpush3.bf16.msra.mxu1 %v2080_v59 }
0x1085   :  { %2016 = vmatprep.subr.bf16.mxu1 %v2253_v9 }
0x108a   :  { %v2214_v63 = vpop.eup %2213 }
0x108b   :  { %v1296_v3 = vsel %vm150_vm2, %v2214_v63, 0.0  ;;  %v2216_v53 = vpop.eup %2215 }
0x108c   :  { %1297 = vadd.xlane.f32.xlu1 %v1296_v3  ;;  %v1299_v4 = vsel %vm150_vm2, %v2216_v53, 0.0 }
0x1090   :  { %1300 = vadd.xlane.f32.xlu1 %v1299_v4  ;;  %v1515_v4 = vrot.slane %v2568_v34, %v673_v61  ;;  %v2167_v61 = vld [vmem:[%s2749_s6 + $0x50] sm:$0xff]  }
0x1119   :  { %v1298_v6 = vpop.xlane.xlu1 %1297 }
0x111a   :  { %2217 = vrcp.f32 %v1298_v6 }
0x111d   :  { %v1301_v7 = vpop.xlane.xlu1 %1300 }
0x111e   :  { %2219 = vrcp.f32 %v1301_v7 }
0x1124   :  { %v2218_v28 = vpop.eup %2217 }
0x1125   :  { %v1303_v29 = vmul.f32 %v2218_v28, %v2214_v63 }
0x1127   :  { %1790 = vst.msk [vmem:[%s2751_s8 + $0x30] sm:$0xff] %vm150_vm2, %v1303_v29  ;;  %2005 = vmatprep.mubr.msk.f32.mxu1 %vm150_vm2, %v1303_v29 }
0x1128   :  { %v2220_v8 = vpop.eup %2219 }
0x1129   :  { %v1305_v32 = vmul.f32 %v2220_v8, %v2216_v53  ;;  %v2166_v8 = vld [vmem:[%s2749_s6 + $0x48] sm:$0xff]  }
0x112b   :  { %1791 = vst.msk [vmem:[%s2751_s8 + $0x38] sm:$0xff] %vm150_vm2, %v1305_v32  ;;  %2006 = vmatmul.mubr.msk.f32.vlgmr.msra.gmra.mrb[26].mxu1 %vm150_vm2, %v1305_v32  ;;  %v2168_v32 = vld [vmem:[%s2749_s6 + $0x58] sm:$0xff]  }
0x112c   :  { %2020 = vmatprep.mubr.msk.bf16.mxu1 %vm2254_vm1, %v2253_v9  ;;  %2017 = vmatpush3.bf16.msra.mxu1 %v2163_v40 }
0x112d   :  { %2018 = vmatprep.subr.bf16.mxu1 %v2253_v9 }
0x11fe   :  { %v2007_v12 = vpop.f32.mrb[26].mxu1 }
0x11ff   :  { %v1387_v13 = vpop.f32.mrb[27].mxu1 }
0x1200   :  { %v2140_v14 = vpack.i.bf16 %v2007_v12, %v1387_v13  ;;  %v2171_v12 = vld [vmem:[%s2749_s6 + $0x70] sm:$0xff]   ;;  %v2172_v13 = vld [vmem:[%s2749_s6 + $0x78] sm:$0xff]   ;;  %s2261_s6 = smov [#allocation2]  }
0x1201   :  { %s1724_s16 = sshll.u32 %s2261_s6, 4  ;;  %s1725_s16 = int_to_ptr.vmem [resolvable:$true] %s1724_s16 }
0x1202   :  { %2141 = vrot.lane.b32.xlu1 %v2140_v14, %s2260_s11  ;;  %v1527_v14 = vrot.slane %v2568_v34, %v684_v21  ;;  %s2229_s1 = scalar_lea.vmem %s1725_s16, 256  ;;  %p2234_p1 = scmp.lt.s32.totalorder %s1725_s16, %s1725_s16 }
0x1203   :  { %p2230_p0 = scmp.ne.s32.totalorder %s1725_s16, %s2229_s1  ;;  %p2235_p2 = scmp.lt.s32.totalorder %s2229_s1, %s2229_s1 }
0x1205   :  { %p2236_p3 = por %p2235_p2, %p2234_p1 }
0x1207   :  { %p2237_p4 = pnand %p2236_p3, %p2230_p0 }
0x1274   :  { %v2142_v15 = vpop.permute.xlu1 %2141 }
0x1275   :  { %v2144_v16 = vunpack.i.h.bf16 %v2142_v15  ;;  %v2143_v17 = vunpack.i.l.bf16 %v2142_v15 }
0x1277   :  { %v1405_v18 = vsel %vm150_vm2, %v1993_v41, %v2144_v16  ;;  %v1404_v19 = vsel %vm150_vm2, %v1180_v42, %v2143_v17  ;;  %v2164_v41 = vld [vmem:[%s2748_s5 + $0x18] sm:$0xff]  }
0x1278   :  { %v1406_v22 = vpack.c.bf16 %v1405_v18, %v1404_v19  ;;  %2019 = vmatpush3.bf16.msra.mxu1 %v2164_v41 }
0x127a   :  { %2013 = vmatmul.mubr.msk.bf16.vlgmr.msra.gmra.mrb[8].mxu0 %vm35_vm0, %v1406_v22 }
0x127b   :  { %2040 = vmatprep.mubr.msk.bf16.mxu0 %vm2254_vm1, %v2253_v9  ;;  %2025 = vmatpush3.bf16.msra.mxu0 %v2165_v57 }
0x127c   :  { %2026 = vmatprep.subr.bf16.mxu0 %v2253_v9 }
0x127f   :  { %2027 = vmatpush3.bf16.msra.mxu0 %v2166_v8 }
0x1280   :  { %2028 = vmatprep.subr.bf16.mxu0 %v2253_v9 }
0x1283   :  { %2029 = vmatpush3.bf16.msra.mxu0 %v2167_v61 }
0x1284   :  { %2030 = vmatprep.subr.bf16.mxu0 %v2253_v9 }
0x1287   :  { %2031 = vmatpush3.bf16.msra.mxu0 %v2168_v32 }
0x1288   :  { %2032 = vmatprep.subr.bf16.mxu0 %v2253_v9 }
0x128b   :  { %2033 = vmatpush3.bf16.msra.mxu0 %v2169_v10 }
0x128c   :  { %2034 = vmatprep.subr.bf16.mxu0 %v2253_v9 }
0x128f   :  { %2035 = vmatpush3.bf16.msra.mxu0 %v2170_v11 }
0x1290   :  { %2036 = vmatprep.subr.bf16.mxu0 %v2253_v9 }
0x1293   :  { %2037 = vmatpush3.bf16.msra.mxu0 %v2171_v12 }
0x1294   :  { %2038 = vmatprep.subr.bf16.mxu0 %v2253_v9 }
0x1297   :  { %2039 = vmatpush3.bf16.msra.mxu0 %v2172_v13 }
0x134d   :  { %v1461_v24 = vpop.f32.mrb[8].mxu0 }
0x134e   :  { %v1468_v25 = vadd.f32 %v1461_v24, %v2543_v2  ;;  %v2014_v30 = vpop.f32.mrb[9].mxu0 }
0x134f   :  { %v1464_v31 = vpop.f32.mrb[10].mxu0 }
0x1350   :  { %v2659_v35 = vadd.f32 %v1473_v23, %v1468_v25  ;;  %v1469_v36 = vadd.f32 %v1464_v31, %v2546_v5  ;;  %v2015_v0 = vpop.f32.mrb[11].mxu0 }
0x1352   :  { %v2662_v37 = vadd.f32 %v1473_v23, %v1469_v36  ;;  %v1476_v1 = vsel %vm35_vm0, %v2659_v35, 0.0  ;;  %v1484_v2 = vmul.f32 %v2659_v35, %v2659_v35 }
0x1353   :  { %1477 = vadd.xlane.f32.xlu1 %v1476_v1 }
0x1354   :  { %v1479_v38 = vsel %vm35_vm0, %v2662_v37, 0.0  ;;  %v1485_v20 = vmul.f32 %v2662_v37, %v2662_v37  ;;  %v1486_v5 = vsel %vm35_vm0, %v1484_v2, 0.0 }
0x1355   :  { %1480 = vadd.xlane.f32.xlu0 %v1479_v38 }
0x1356   :  { %v1489_v39 = vsel %vm35_vm0, %v1485_v20, 0.0 }
0x1357   :  { %1490 = vadd.xlane.f32.xlu1 %v1489_v39 }
0x1359   :  { %1487 = vadd.xlane.f32.xlu0 %v1486_v5 }
0x13e0   :  { %v1478_v42 = vpop.xlane.xlu1 %1477 }
0x13e1   :  { %v1482_v45 = vmul.f32 0.03125, %v1478_v42 }
0x13e2   :  { %v1481_v44 = vpop.xlane.xlu0 %1480 }
0x13e3   :  { %v1483_v46 = vmul.f32 0.03125, %v1481_v44  ;;  %v1494_v55 = vmul.f32 %v1482_v45, %v1482_v45  ;;  %v1498_v62 = vsub.f32 %v2659_v35, %v1482_v45  ;;  %v1714_v45 = vrot.slane %v2568_v34, %v870_v54 }
0x13e4   :  { %v1491_v27 = vpop.xlane.xlu1 %1490 }
0x13e5   :  { %v1495_v47 = vmul.f32 %v1483_v46, %v1483_v46  ;;  %v1493_v48 = vmul.f32 0.03125, %v1491_v27  ;;  %v1499_v58 = vsub.f32 %v2662_v37, %v1483_v46 }
0x13e6   :  { %v1488_v49 = vpop.xlane.xlu0 %1487 }
0x13e7   :  { %v1497_v33 = vsub.f32 %v1493_v48, %v1495_v47  ;;  %v1492_v50 = vmul.f32 0.03125, %v1488_v49 }
0x13e9   :  { %v1501_v52 = vadd.f32 1e-05, %v1497_v33  ;;  %v1496_v43 = vsub.f32 %v1492_v50, %v1494_v55 }
0x13eb   :  { %2221 = vrsqrt.f32 %v1501_v52  ;;  %v1500_v56 = vadd.f32 1e-05, %v1496_v43 }
0x13ed   :  { %2223 = vrsqrt.f32 %v1500_v56 }
0x13f5   :  { %v2222_v51 = vpop.eup %2221 }
0x13f6   :  { %v1505_v59 = vmul.f32 %v2222_v51, %v1499_v58 }
0x13f7   :  { %v2224_v63 = vpop.eup %2223 }
0x13f8   :  { %v1511_v3 = vmul.f32 %v1509_v60, %v1505_v59  ;;  %v1504_v53 = vmul.f32 %v2224_v63, %v1498_v62 }
0x13fa   :  { %v1510_v6 = vmul.f32 %v1509_v60, %v1504_v53  ;;  %v1517_v28 = vadd.f32 %v1515_v4, %v1511_v3 }
0x13fc   :  { %v1516_v7 = vadd.f32 %v1515_v4, %v1510_v6 }
0x13fe   :  { %v1518_v29 = vpack.c.bf16 %v1517_v28, %v1516_v7 }
0x1400   :  { %2021 = vmatmul.mubr.msk.bf16.vlgmr.msra.gmra.mrb[28].mxu1 %vm35_vm0, %v1518_v29 }
0x14d3   :  { %v1577_v15 = vpop.f32.mrb[28].mxu1 }
0x14d4   :  { %v1578_v16 = vadd.f32 %v1577_v15, %v1527_v14  ;;  %v2022_v17 = vpop.f32.mrb[29].mxu1 }
0x14d5   :  { %v1580_v18 = vpop.f32.mrb[30].mxu1 }
0x14d6   :  { %v1584_v19 = vmul.f32 %v1578_v16, %v1578_v16  ;;  %v1581_v22 = vadd.f32 %v1580_v18, %v1527_v14  ;;  %v2023_v23 = vpop.f32.mrb[31].mxu1 }
0x14d8   :  { %v1586_v24 = vmul.f32 %v1584_v19, %v1578_v16  ;;  %v1585_v25 = vmul.f32 %v1581_v22, %v1581_v22 }
0x14da   :  { %v1588_v30 = vmul.f32 0.044715, %v1586_v24  ;;  %v1587_v9 = vmul.f32 %v1585_v25, %v1581_v22 }
0x14dc   :  { %v1590_v31 = vadd.f32 %v1588_v30, %v1578_v16  ;;  %v1589_v36 = vmul.f32 0.044715, %v1587_v9 }
0x14de   :  { %v1592_v0 = vmul.f32 0.7978846, %v1590_v31  ;;  %v1591_v1 = vadd.f32 %v1589_v36, %v1581_v22 }
0x14e0   :  { %2225 = vtanh.f32 %v1592_v0  ;;  %v1593_v38 = vmul.f32 0.7978846, %v1591_v1 }
0x14e2   :  { %2227 = vtanh.f32 %v1593_v38 }
0x14ea   :  { %v2226_v20 = vpop.eup %2225 }
0x14eb   :  { %v1596_v21 = vadd.f32 1.0, %v2226_v20 }
0x14ec   :  { %v2228_v2 = vpop.eup %2227 }
0x14ed   :  { %v1598_v39 = vmul.f32 0.5, %v1596_v21  ;;  %v1597_v5 = vadd.f32 1.0, %v2228_v2 }
0x14ef   :  { %v1599_v40 = vmul.f32 0.5, %v1597_v5  ;;  %v1600_v41 = vmul.f32 %v1598_v39, %v1578_v16 }
0x14f1   :  { %v1601_v42 = vmul.f32 %v1599_v40, %v1581_v22 }
0x14f3   :  { %v1602_v44 = vpack.c.bf16 %v1601_v42, %v1600_v41 }
0x14f5   :  { %2041 = vmatmul.mubr.bf16.vlgmr.msra.gmra.mrb[12].mxu0 %v1602_v44 }
0x15c8   :  { %v1702_v46 = vpop.f32.mrb[12].mxu0 }
0x15c9   :  { %v1709_v27 = vadd.f32 %v1702_v46, %v2659_v35  ;;  %v2042_v47 = vpop.f32.mrb[13].mxu0 }
0x15ca   :  { %v1705_v48 = vpop.f32.mrb[14].mxu0 }
0x15cb   :  { %v1715_v49 = vadd.f32 %v1714_v45, %v1709_v27  ;;  %v1710_v55 = vadd.f32 %v1705_v48, %v2662_v37  ;;  %v2043_v33 = vpop.f32.mrb[15].mxu0 }
0x15cd   :  { %1717 = vst.msk [vmem:[#allocation2] sm:$0xff] %vm35_vm0, %v1715_v49  ;;  %v1716_v50 = vadd.f32 %v1714_v45, %v1710_v55 }
0x15cf   :  { %1718 = vst.msk [vmem:[#allocation2 + $0x8] sm:$0xff] %vm35_vm0, %v1716_v50 }
0x15d0   :  { %2240 = shalt.err (!%p2237_p4)
}
0x15d1   :  { %s2241_s23 = scalar_lea.hbm %s2750_s7, 256 }
0x15d2   :  { %p2242_p5 = scmp.ne.s32.totalorder %s2750_s7, %s2241_s23  ;;  %p2245_p6 = scmp.lt.u32.totalorder %s2241_s23, %s2750_s7 }
0x15d4   :  { %p2247_p7 = pnand %p2245_p6, %p2242_p5 }
0x15d6   :  { %2250 = shalt.err (!%p2247_p7)
}
0x15d7   :  { %s2262_s4 = smov 128   ;;  %s2263_s8 = smov 8  }
0x15d8   :  { %1730 = dma.vmem_to_hbm [thread:$0]  %s1725_s16, 256, %s2750_s7, [#allocation3], %s2262_s4, %s2262_s4, %s2263_s8  }
0x15d9   :  { %2251 = dma.done.wait [#allocation3], 256  }
0x15da   :  { %2252 = vsyncadd [#allocation3], 4294967040 }
0x15db   :  { %1738 = vsyncpa [#allocation3], 1 }

</bundles_post_ra>
